<compile_context>
chip_gen: v7x
topology: tpu7x:2x2x1
jax: 0.10.0
libtpu: 0.0.40
codegen_flags: <defaults>
</compile_context>

<pallas_src>
import functools
import math

import jax
import jax.numpy as jnp
from jax.experimental import pallas as pl
from jax.experimental.pallas import tpu as pltpu


# ------------------------------- helpers -------------------------------------

def _round_up(x, m):
    return ((x + m - 1) // m) * m


def _const_spec(shape):
    # Whole-array block with a constant block index (legal: block dims equal
    # the full array dims), so the operand is DMA'd once and stays resident.
    return pl.BlockSpec(shape, lambda j, n=len(shape): (0,) * n)


def _pick_col_tile(d_img):
    for nt in (512, 256, 128):
        if d_img % nt == 0:
            return nt
    return d_img   # fallback: single full-width block


# --------------------------- shared encoder body ------------------------------

def _encode(img_ref, pose_ref, eps_ref, ew1i_ref, ew1p_ref, eb1_ref,
            ew2_ref, eb2_ref, *, Bp, S, z, pose_dim, post_width):
    """Posterior (scene encoder) + reparameterized sample.

    Returns (post_slab (Bp, post_width) f32, state (Bp, z) f32)."""
    f32, bf16 = jnp.float32, jnp.bfloat16

    # h = img @ W1_img + pose @ W1_pose + b1.  Images arrive already bf16.
    # The pose term is pose_dim rank-1 broadcast updates (pose_dim <= 8; for
    # larger pose_dim switch back to a padded-K matmul -- MXU has slack here).
    h = jnp.dot(img_ref[...], ew1i_ref[...], preferred_element_type=f32) + eb1_ref[...]
    pose = pose_ref[...]
    w1p = ew1p_ref[...]
    for k in range(pose_dim):
        h = h + pose[:, k:k + 1] * w1p[k:k + 1, :]
    h = jnp.maximum(h, 0.0)

    # ew2 is zero-padded to a 128-lane output width so r / r_sum are lane-dense.
    r = jnp.dot(h.astype(bf16), ew2_ref[...], preferred_element_type=f32) + eb2_ref[...]

    # GQN aggregation r_scene = sum_views r_view.  Rows are view-major
    # (row = s*Bp + b) with Bp a multiple of 8, so every slice is
    # sublane-aligned and the sum is S-1 plain vreg adds.
    r_sum = r[0:Bp]
    for s in range(1, S):
        r_sum = r_sum + r[s * Bp:(s + 1) * Bp]

    mean = r_sum[:, 0:z]
    raw = r_sum[:, z:2 * z]
    # numerically-stable softplus (f32) + floor, matching Normal stdev param.
    stdev = jnp.maximum(raw, 0.0) + jnp.log(1.0 + jnp.exp(-jnp.abs(raw))) + 1e-4
    # reparameterized sample of the scene latent (eps supplied by the host).
    state = mean + stdev * eps_ref[...]

    pad = post_width - 3 * z
    pieces = [mean, stdev, state]
    if pad > 0:
        pieces.append(jnp.zeros((Bp, pad), f32))
    post = jnp.concatenate(pieces, axis=-1)          # one lane-dense slab
    return post, state


# ------------------------------ fused kernel ----------------------------------

def _gqn_fused_kernel(img_ref, pose_ref, pq_ref, eps_ref,
                      ew1i_ref, ew1p_ref, eb1_ref, ew2_ref, eb2_ref,
                      dw1p_ref, dw1z_ref, db1_ref, dw2_ref, db2_ref,
                      post_ref, img_out_ref,
                      hd_ref,
                      *, Bp, S, Q, z, pose_dim, post_width):
    f32, bf16 = jnp.float32, jnp.bfloat16
    j = pl.program_id(0)

    # Encoder + sampling + decoder hidden layer run ONCE (first column block)
    # and persist in VMEM scratch; later grid steps only stream dw2 columns.
    @pl.when(j == 0)
    def _():
        post, state = _encode(img_ref, pose_ref, eps_ref, ew1i_ref, ew1p_ref,
                              eb1_ref, ew2_ref, eb2_ref,
                              Bp=Bp, S=S, z=z, pose_dim=pose_dim,
                              post_width=post_width)
        post_ref[...] = post                         # single unmasked store

        # Decoder rows are query-major (row = q*Bp + b); the per-scene latent
        # contribution is replicated with a static sublane-aligned concat.
        zc = jnp.dot(state.astype(bf16), dw1z_ref[...],
                     preferred_element_type=f32)     # (Bp, dh)
        hd = jnp.concatenate([zc] * Q, axis=0) + db1_ref[...]
        pq = pq_ref[...]
        w1pd = dw1p_ref[...]
        for k in range(pose_dim):
            hd = hd + pq[:, k:k + 1] * w1pd[k:k + 1, :]
        hd_ref[...] = jnp.maximum(hd, 0.0).astype(bf16)

    # Column-tiled decoder output: dw2/db2/img_out streamed in blocks along
    # d_img so the dw2 DMA pipelines behind the matmul + sigmoid.
    y = jnp.dot(hd_ref[...], dw2_ref[...], preferred_element_type=f32) + db2_ref[...]
    img_out_ref[...] = jax.nn.sigmoid(y).astype(img_out_ref.dtype)


def _gqn_encoder_kernel(img_ref, pose_ref, eps_ref,
                        ew1i_ref, ew1p_ref, eb1_ref, ew2_ref, eb2_ref,
                        post_ref, *, Bp, S, z, pose_dim, post_width):
    post, _ = _encode(img_ref, pose_ref, eps_ref, ew1i_ref, ew1p_ref,
                      eb1_ref, ew2_ref, eb2_ref,
                      Bp=Bp, S=S, z=z, pose_dim=pose_dim,
                      post_width=post_width)
    post_ref[...] = post


# ------------------------------ model wrapper ---------------------------------

class GQNModelPallas:
    """JAX/Pallas re-implementation of GQNModel.forward (reconstruct path)."""

    def __init__(self, key,
                 observations={'image': [3, 16, 16], 'pose': 3, 'z_size': 32},
                 enc_hidden=128, dec_hidden=256):
        self._observations = observations
        C, H, W = observations['image']
        self.C, self.H, self.W = C, H, W
        self.pose_dim = observations['pose']
        self.z_size = observations['z_size']
        self.enc_hidden = enc_hidden
        self.dec_hidden = dec_hidden

        d_img = C * H * W
        self.d_img = d_img
        z = self.z_size
        self.post_width = _round_up(3 * z, 128)       # lane-dense slab width
        self.r_width = _round_up(2 * z, 128)          # padded encoder output
        self.col_tile = _pick_col_tile(d_img)

        k1, k2, k3, k4, k5, k6 = jax.random.split(key, 6)
        s = 0.02
        f32, bf16 = jnp.float32, jnp.bfloat16
        # Posterior (scene encoder) params -- large matrices stored in bf16.
        self.ew1_img = (s * jax.random.normal(k1, (d_img, enc_hidden))).astype(bf16)
        self.ew1_pose = (s * jax.random.normal(k2, (self.pose_dim, enc_hidden))).astype(f32)
        self.eb1 = jnp.zeros((1, enc_hidden), f32)
        ew2 = (s * jax.random.normal(k3, (enc_hidden, 2 * z))).astype(f32)
        self.ew2 = jnp.pad(ew2, ((0, 0), (0, self.r_width - 2 * z))).astype(bf16)
        self.eb2 = jnp.zeros((1, self.r_width), f32)
        # Likelihood (scene decoder) params.
        self.dw1_pose = (s * jax.random.normal(k4, (self.pose_dim, dec_hidden))).astype(f32)
        self.dw1_z = (s * jax.random.normal(k5, (z, dec_hidden))).astype(bf16)
        self.db1 = jnp.zeros((1, dec_hidden), f32)
        self.dw2 = (s * jax.random.normal(k6, (dec_hidden, d_img))).astype(bf16)
        self.db2 = jnp.zeros((1, d_img), f32)

        self._state, self._post = None, None

    def reset(self, state=None, post=None):
        self._state, self._post = state, post

    # ------------------------------------------------------------------
    def _run_fused(self, img_sb, pose_sb, pq_qb, eps, Bp, S, Q):
        z = self.z_size
        P = self.post_width
        d_img, eh, dh, pd = self.d_img, self.enc_hidden, self.dec_hidden, self.pose_dim
        NT = self.col_tile
        n_col = d_img // NT

        kernel = functools.partial(_gqn_fused_kernel,
                                   Bp=Bp, S=S, Q=Q, z=z, pose_dim=pd,
                                   post_width=P)

        inputs = (img_sb, pose_sb, pq_qb, eps,
                  self.ew1_img, self.ew1_pose, self.eb1, self.ew2, self.eb2,
                  self.dw1_pose, self.dw1_z, self.db1, self.dw2, self.db2)

        out_shapes = (jax.ShapeDtypeStruct((Bp, P), jnp.float32),
                      jax.ShapeDtypeStruct((Q * Bp, d_img), jnp.bfloat16))

        in_specs = [_const_spec(a.shape) for a in inputs[:12]]
        in_specs += [pl.BlockSpec((dh, NT), lambda j: (0, j)),    # dw2 column block
                     pl.BlockSpec((1, NT), lambda j: (0, j))]     # db2 column block
        out_specs = (pl.BlockSpec((Bp, P), lambda j: (0, 0)),     # resident slab
                     pl.BlockSpec((Q * Bp, NT), lambda j: (0, j)))

        flops = 2 * (S * Bp) * (d_img * eh + pd * eh + eh * self.r_width) \
            + 2 * (Bp * z * dh + (Q * Bp) * pd * dh + (Q * Bp) * dh * d_img)
        transcendentals = Bp * z + (Q * Bp) * d_img
        bytes_accessed = sum(int(a.size) * a.dtype.itemsize for a in inputs) \
            + Bp * P * 4 + (Q * Bp) * d_img * 2

        return pl.pallas_call(
            kernel,
            out_shape=out_shapes,
            grid=(n_col,),
            in_specs=in_specs,
            out_specs=out_specs,
            scratch_shapes=[pltpu.VMEM((Q * Bp, dh), jnp.bfloat16)],
            compiler_params=pltpu.CompilerParams(
                dimension_semantics=("arbitrary",)),
            cost_estimate=pl.CostEstimate(
                flops=int(flops),
                transcendentals=int(transcendentals),
                bytes_accessed=int(bytes_accessed)),
        )(*inputs)

    # ------------------------------------------------------------------
    def _run_encoder(self, img_sb, pose_sb, eps, Bp, S):
        z = self.z_size
        P = self.post_width
        d_img, eh, pd = self.d_img, self.enc_hidden, self.pose_dim

        kernel = functools.partial(_gqn_encoder_kernel,
                                   Bp=Bp, S=S, z=z, pose_dim=pd, post_width=P)

        inputs = (img_sb, pose_sb, eps,
                  self.ew1_img, self.ew1_pose, self.eb1, self.ew2, self.eb2)

        flops = 2 * (S * Bp) * (d_img * eh + pd * eh + eh * self.r_width)
        bytes_accessed = sum(int(a.size) * a.dtype.itemsize for a in inputs) + Bp * P * 4

        return pl.pallas_call(
            kernel,
            out_shape=jax.ShapeDtypeStruct((Bp, P), jnp.float32),
            grid=(1,),
            in_specs=[_const_spec(a.shape) for a in inputs],
            out_specs=_const_spec((Bp, P)),
            compiler_params=pltpu.CompilerParams(
                dimension_semantics=("arbitrary",)),
            cost_estimate=pl.CostEstimate(
                flops=int(flops),
                transcendentals=int(Bp * z),
                bytes_accessed=int(bytes_accessed)),
        )(*inputs)

    # ------------------------------------------------------------------
    def forward(self, observations, place=None, reconstruct=True, sample_key=None):
        if sample_key is None:
            sample_key = jax.random.PRNGKey(1)
        result = dict(observations)
        z = self.z_size
        f32, bf16 = jnp.float32, jnp.bfloat16

        img = observations['image']                  # (B, S, C, H, W)
        pose = observations['pose']                  # (B, S, pose_dim)
        B, S = img.shape[0], img.shape[1]
        Bp = _round_up(max(B, 1), 8)                 # sublane-aligned batch

        # view-major (row = s*Bp + b) layout; images cast to bf16 on the host.
        img_sb = jnp.transpose(img, (1, 0, 2, 3, 4)).reshape(S, B, self.d_img)
        img_sb = jnp.pad(img_sb, ((0, 0), (0, Bp - B), (0, 0))).astype(bf16)
        img_sb = img_sb.reshape(S * Bp, self.d_img)
        pose_sb = jnp.transpose(pose.astype(f32), (1, 0, 2))
        pose_sb = jnp.pad(pose_sb, ((0, 0), (0, Bp - B), (0, 0)))
        pose_sb = pose_sb.reshape(S * Bp, self.pose_dim)

        # TODO(synk): MultivariateNormal.sample is stochastic; reproduced as a
        # fixed-key reparameterized draw (mean + stdev * eps) for determinism.
        eps = jax.random.normal(sample_key, (B, z), dtype=f32)
        eps = jnp.pad(eps, ((0, Bp - B), (0, 0)))

        have_query = reconstruct and ('pose_query' in observations)
        if have_query:
            pq = observations['pose_query']          # (B, Q, pose_dim)
            Q = pq.shape[1]
            # query-major (row = q*Bp + b) so latent replication is a concat.
            pq_qb = jnp.transpose(pq.astype(f32), (1, 0, 2))
            pq_qb = jnp.pad(pq_qb, ((0, 0), (0, Bp - B), (0, 0)))
            pq_qb = pq_qb.reshape(Q * Bp, self.pose_dim)
            post, img_pred = self._run_fused(img_sb, pose_sb, pq_qb, eps, Bp, S, Q)
        else:
            # posterior-only kernel: no decoder weights streamed, no dummy decode.
            post = self._run_encoder(img_sb, pose_sb, eps, Bp, S)
            img_pred = None

        post = post[:B]
        mean_q = post[:, 0:z][:, None, :]            # (B, 1, z)
        stdev_q = post[:, z:2 * z][:, None, :]       # (B, 1, z)
        state = post[:, 2 * z:3 * z][:, None, :]     # (B, 1, z)

        # mirror `self._post = MultivariateNormal(mean.unsqueeze(1), stdev.unsqueeze(1))`
        self._post = (mean_q, stdev_q)
        self._state = state
        result['place'] = self._post
        result['state'] = state

        if have_query:
            result['image_predicted'] = (
                img_pred.reshape(Q, Bp, self.C, self.H, self.W)[:, :B]
                        .transpose(1, 0, 2, 3, 4).astype(f32))   # (B, Q, C, H, W)

        # TODO(synk): PositionalDecoder ('pose_predicted'), RandomSeqQuery and
        # the `place`-override branch are optional injected submodules of the
        # original model and are not instantiated here.
        return result


# ---------------------------------- main --------------------------------------

if __name__ == "__main__":
    B, S, Q = 2, 4, 2
    C, H, W = 3, 16, 16
    pose_dim, z_size = 3, 32

    key = jax.random.PRNGKey(0)
    k_param, k_img, k_pose, k_query, k_sample = jax.random.split(key, 5)

    model = GQNModelPallas(
        k_param,
        observations={'image': [C, H, W], 'pose': pose_dim, 'z_size': z_size},
    )

    observations = {
        'image': jax.random.uniform(k_img, (B, S, C, H, W), dtype=jnp.float32),
        'pose': jax.random.normal(k_pose, (B, S, pose_dim), dtype=jnp.float32),
        'pose_query': jax.random.normal(k_query, (B, Q, pose_dim), dtype=jnp.float32),
    }

    result = model.forward(observations, sample_key=k_sample)
    jax.block_until_ready(result['image_predicted'])
    jax.block_until_ready(result['state'])

    assert result['state'].shape == (B, 1, z_size)
    assert result['place'][0].shape == (B, 1, z_size)
    assert result['place'][1].shape == (B, 1, z_size)
    assert result['image_predicted'].shape == (B, Q, C, H, W)
    assert bool(jnp.all(jnp.isfinite(result['image_predicted'])))
    assert bool(jnp.all(result['image_predicted'] >= 0.0))
    assert bool(jnp.all(result['image_predicted'] <= 1.0))
    assert bool(jnp.all(result['place'][1] > 0.0))

    # posterior-only path (no pose_query): decoder is skipped entirely.
    result2 = model.forward({'image': observations['image'],
                             'pose': observations['pose']},
                            sample_key=k_sample)
    jax.block_until_ready(result2['state'])
    assert result2['state'].shape == (B, 1, z_size)
    assert 'image_predicted' not in result2

    print("KERNEL_OK")
</pallas_src>

<mosaic_0001>
module attributes {stable_mosaic.version = 11 : i64} {
  func.func @_gqn_fused_kernel(%arg0: i32, %arg1: memref<32x768xbf16, #tpu.memory_space<vmem>>, %arg2: memref<32x3xf32, #tpu.memory_space<vmem>>, %arg3: memref<16x3xf32, #tpu.memory_space<vmem>>, %arg4: memref<8x32xf32, #tpu.memory_space<vmem>>, %arg5: memref<768x128xbf16, #tpu.memory_space<vmem>>, %arg6: memref<3x128xf32, #tpu.memory_space<vmem>>, %arg7: memref<1x128xf32, #tpu.memory_space<vmem>>, %arg8: memref<128x128xbf16, #tpu.memory_space<vmem>>, %arg9: memref<1x128xf32, #tpu.memory_space<vmem>>, %arg10: memref<3x256xf32, #tpu.memory_space<vmem>>, %arg11: memref<32x256xbf16, #tpu.memory_space<vmem>>, %arg12: memref<1x256xf32, #tpu.memory_space<vmem>>, %arg13: memref<256x256xbf16, #tpu.memory_space<vmem>>, %arg14: memref<1x256xf32, #tpu.memory_space<vmem>>, %arg15: memref<8x128xf32, #tpu.memory_space<vmem>>, %arg16: memref<16x256xbf16, #tpu.memory_space<vmem>>, %arg17: memref<16x256xbf16, #tpu.memory_space<vmem>>) attributes {dimension_semantics = [#tpu.dimension_semantics<arbitrary>], iteration_bounds = array<i64: 3>, scalar_prefetch = 0 : i64, scratch_operands = 1 : i64, tpu.core_type = #tpu.core_type<tc>, window_params = [{pipeline_mode = #tpu.pipeline_mode<synchronous>, transform_indices = @transform_0, window_bounds = array<i64: 32, 768>}, {pipeline_mode = #tpu.pipeline_mode<synchronous>, transform_indices = @transform_1, window_bounds = array<i64: 32, 3>}, {pipeline_mode = #tpu.pipeline_mode<synchronous>, transform_indices = @transform_2, window_bounds = array<i64: 16, 3>}, {pipeline_mode = #tpu.pipeline_mode<synchronous>, transform_indices = @transform_3, window_bounds = array<i64: 8, 32>}, {pipeline_mode = #tpu.pipeline_mode<synchronous>, transform_indices = @transform_4, window_bounds = array<i64: 768, 128>}, {pipeline_mode = #tpu.pipeline_mode<synchronous>, transform_indices = @transform_5, window_bounds = array<i64: 3, 128>}, {pipeline_mode = #tpu.pipeline_mode<synchronous>, transform_indices = @transform_6, window_bounds = array<i64: 1, 128>}, {pipeline_mode = #tpu.pipeline_mode<synchronous>, transform_indices = @transform_7, window_bounds = array<i64: 128, 128>}, {pipeline_mode = #tpu.pipeline_mode<synchronous>, transform_indices = @transform_8, window_bounds = array<i64: 1, 128>}, {pipeline_mode = #tpu.pipeline_mode<synchronous>, transform_indices = @transform_9, window_bounds = array<i64: 3, 256>}, {pipeline_mode = #tpu.pipeline_mode<synchronous>, transform_indices = @transform_10, window_bounds = array<i64: 32, 256>}, {pipeline_mode = #tpu.pipeline_mode<synchronous>, transform_indices = @transform_11, window_bounds = array<i64: 1, 256>}, {transform_indices = @transform_12, window_bounds = array<i64: 256, 256>}, {transform_indices = @transform_13, window_bounds = array<i64: 1, 256>}, {pipeline_mode = #tpu.pipeline_mode<synchronous>, transform_indices = @transform_14, window_bounds = array<i64: 8, 128>}, {transform_indices = @transform_15, window_bounds = array<i64: 16, 256>}]} {
    %c0_i32 = arith.constant 0 : i32
    %0 = arith.cmpi eq, %arg0, %c0_i32 : i32
    %1 = arith.extui %0 : i1 to i32
    %c0_i32_0 = arith.constant 0 : i32
    %2 = arith.cmpi ne, %1, %c0_i32_0 : i32
    scf.if %2 {
      %c0_9 = arith.constant 0 : index
      %c0_10 = arith.constant 0 : index
      %16 = vector.load %arg1[%c0_9, %c0_10] : memref<32x768xbf16, #tpu.memory_space<vmem>>, vector<32x768xbf16>
      %c0_11 = arith.constant 0 : index
      %c0_12 = arith.constant 0 : index
      %17 = vector.load %arg5[%c0_11, %c0_12] : memref<768x128xbf16, #tpu.memory_space<vmem>>, vector<768x128xbf16>
      %cst_13 = arith.constant dense<0.000000e+00> : vector<32x128xf32>
      %18 = tpu.matmul %16, %17, %cst_13 {dimension_numbers = #tpu.dot_dimension_numbers<[1], [0], [0], [1], [0, 0, 1, 1], [], []>} : vector<32x768xbf16>, vector<768x128xbf16>, vector<32x128xf32> -> vector<32x128xf32>
      %c0_14 = arith.constant 0 : index
      %c0_15 = arith.constant 0 : index
      %19 = vector.load %arg7[%c0_14, %c0_15] : memref<1x128xf32, #tpu.memory_space<vmem>>, vector<1x128xf32>
      %20 = vector.broadcast %19 : vector<1x128xf32> to vector<32x128xf32>
      %21 = arith.addf %18, %20 : vector<32x128xf32>
      %c0_16 = arith.constant 0 : index
      %c0_17 = arith.constant 0 : index
      %22 = vector.load %arg2[%c0_16, %c0_17] : memref<32x3xf32, #tpu.memory_space<vmem>>, vector<32x3xf32>
      %c0_18 = arith.constant 0 : index
      %c0_19 = arith.constant 0 : index
      %23 = vector.load %arg6[%c0_18, %c0_19] : memref<3x128xf32, #tpu.memory_space<vmem>>, vector<3x128xf32>
      %24 = vector.extract_strided_slice %22 {offsets = [0, 0], sizes = [32, 1], strides = [1, 1]} : vector<32x3xf32> to vector<32x1xf32>
      %25 = vector.extract_strided_slice %23 {offsets = [0, 0], sizes = [1, 128], strides = [1, 1]} : vector<3x128xf32> to vector<1x128xf32>
      %26 = vector.broadcast %24 : vector<32x1xf32> to vector<32x128xf32>
      %27 = vector.broadcast %25 : vector<1x128xf32> to vector<32x128xf32>
      %28 = arith.mulf %26, %27 : vector<32x128xf32>
      %29 = arith.addf %21, %28 : vector<32x128xf32>
      %30 = vector.extract_strided_slice %22 {offsets = [0, 1], sizes = [32, 1], strides = [1, 1]} : vector<32x3xf32> to vector<32x1xf32>
      %31 = vector.extract_strided_slice %23 {offsets = [1, 0], sizes = [1, 128], strides = [1, 1]} : vector<3x128xf32> to vector<1x128xf32>
      %32 = vector.broadcast %30 : vector<32x1xf32> to vector<32x128xf32>
      %33 = vector.broadcast %31 : vector<1x128xf32> to vector<32x128xf32>
      %34 = arith.mulf %32, %33 : vector<32x128xf32>
      %35 = arith.addf %29, %34 : vector<32x128xf32>
      %36 = vector.extract_strided_slice %22 {offsets = [0, 2], sizes = [32, 1], strides = [1, 1]} : vector<32x3xf32> to vector<32x1xf32>
      %37 = vector.extract_strided_slice %23 {offsets = [2, 0], sizes = [1, 128], strides = [1, 1]} : vector<3x128xf32> to vector<1x128xf32>
      %38 = vector.broadcast %36 : vector<32x1xf32> to vector<32x128xf32>
      %39 = vector.broadcast %37 : vector<1x128xf32> to vector<32x128xf32>
      %40 = arith.mulf %38, %39 : vector<32x128xf32>
      %41 = arith.addf %35, %40 : vector<32x128xf32>
      %cst_20 = arith.constant 0.000000e+00 : f32
      %42 = vector.broadcast %cst_20 : f32 to vector<32x128xf32>
      %43 = arith.maximumf %41, %42 : vector<32x128xf32>
      %44 = arith.truncf %43 : vector<32x128xf32> to vector<32x128xbf16>
      %c0_21 = arith.constant 0 : index
      %c0_22 = arith.constant 0 : index
      %45 = vector.load %arg8[%c0_21, %c0_22] : memref<128x128xbf16, #tpu.memory_space<vmem>>, vector<128x128xbf16>
      %cst_23 = arith.constant dense<0.000000e+00> : vector<32x128xf32>
      %46 = tpu.matmul %44, %45, %cst_23 {dimension_numbers = #tpu.dot_dimension_numbers<[1], [0], [0], [1], [0, 0, 1, 1], [], []>} : vector<32x128xbf16>, vector<128x128xbf16>, vector<32x128xf32> -> vector<32x128xf32>
      %c0_24 = arith.constant 0 : index
      %c0_25 = arith.constant 0 : index
      %47 = vector.load %arg9[%c0_24, %c0_25] : memref<1x128xf32, #tpu.memory_space<vmem>>, vector<1x128xf32>
      %48 = vector.broadcast %47 : vector<1x128xf32> to vector<32x128xf32>
      %49 = arith.addf %46, %48 : vector<32x128xf32>
      %50 = vector.extract_strided_slice %49 {offsets = [0, 0], sizes = [8, 128], strides = [1, 1]} : vector<32x128xf32> to vector<8x128xf32>
      %51 = vector.extract_strided_slice %49 {offsets = [8, 0], sizes = [8, 128], strides = [1, 1]} : vector<32x128xf32> to vector<8x128xf32>
      %52 = arith.addf %50, %51 : vector<8x128xf32>
      %53 = vector.extract_strided_slice %49 {offsets = [16, 0], sizes = [8, 128], strides = [1, 1]} : vector<32x128xf32> to vector<8x128xf32>
      %54 = arith.addf %52, %53 : vector<8x128xf32>
      %55 = vector.extract_strided_slice %49 {offsets = [24, 0], sizes = [8, 128], strides = [1, 1]} : vector<32x128xf32> to vector<8x128xf32>
      %56 = arith.addf %54, %55 : vector<8x128xf32>
      %57 = vector.extract_strided_slice %56 {offsets = [0, 0], sizes = [8, 32], strides = [1, 1]} : vector<8x128xf32> to vector<8x32xf32>
      %58 = vector.extract_strided_slice %56 {offsets = [0, 32], sizes = [8, 32], strides = [1, 1]} : vector<8x128xf32> to vector<8x32xf32>
      %cst_26 = arith.constant 0.000000e+00 : f32
      %59 = vector.broadcast %cst_26 : f32 to vector<8x32xf32>
      %60 = arith.maximumf %58, %59 : vector<8x32xf32>
      %61 = math.absf %58 : vector<8x32xf32>
      %cst_27 = arith.constant 0.000000e+00 : f32
      %62 = vector.broadcast %cst_27 : f32 to vector<8x32xf32>
      %63 = arith.subf %62, %61 : vector<8x32xf32>
      %64 = math.exp %63 : vector<8x32xf32>
      %cst_28 = arith.constant 1.000000e+00 : f32
      %65 = vector.broadcast %cst_28 : f32 to vector<8x32xf32>
      %66 = arith.addf %65, %64 : vector<8x32xf32>
      %67 = math.log %66 : vector<8x32xf32>
      %68 = arith.addf %60, %67 : vector<8x32xf32>
      %cst_29 = arith.constant 9.99999974E-5 : f32
      %69 = vector.broadcast %cst_29 : f32 to vector<8x32xf32>
      %70 = arith.addf %68, %69 : vector<8x32xf32>
      %c0_30 = arith.constant 0 : index
      %c0_31 = arith.constant 0 : index
      %71 = vector.load %arg4[%c0_30, %c0_31] : memref<8x32xf32, #tpu.memory_space<vmem>>, vector<8x32xf32>
      %72 = arith.mulf %70, %71 : vector<8x32xf32>
      %73 = arith.addf %57, %72 : vector<8x32xf32>
      %cst_32 = arith.constant 0.000000e+00 : f32
      %74 = vector.broadcast %cst_32 : f32 to vector<8x32xf32>
      %75 = tpu.concatenate %57, %70, %73, %74 in 1 : vector<8x32xf32>, vector<8x32xf32>, vector<8x32xf32>, vector<8x32xf32> -> vector<8x128xf32>
      %c0_33 = arith.constant 0 : index
      %c0_34 = arith.constant 0 : index
      %76 = vector.load %arg15[%c0_33, %c0_34] : memref<8x128xf32, #tpu.memory_space<vmem>>, vector<8x128xf32>
      tpu.vector_store %arg15[%c0_33, %c0_34], %75 {strides = array<i32>} : memref<8x128xf32, #tpu.memory_space<vmem>>, vector<8x128xf32>,
      %77 = arith.truncf %73 : vector<8x32xf32> to vector<8x32xbf16>
      %c0_35 = arith.constant 0 : index
      %c0_36 = arith.constant 0 : index
      %78 = vector.load %arg11[%c0_35, %c0_36] : memref<32x256xbf16, #tpu.memory_space<vmem>>, vector<32x256xbf16>
      %cst_37 = arith.constant dense<0.000000e+00> : vector<8x256xf32>
      %79 = tpu.matmul %77, %78, %cst_37 {dimension_numbers = #tpu.dot_dimension_numbers<[1], [0], [0], [1], [0, 0, 1, 1], [], []>} : vector<8x32xbf16>, vector<32x256xbf16>, vector<8x256xf32> -> vector<8x256xf32>
      %80 = tpu.concatenate %79, %79 in 0 : vector<8x256xf32>, vector<8x256xf32> -> vector<16x256xf32>
      %c0_38 = arith.constant 0 : index
      %c0_39 = arith.constant 0 : index
      %81 = vector.load %arg12[%c0_38, %c0_39] : memref<1x256xf32, #tpu.memory_space<vmem>>, vector<1x256xf32>
      %82 = vector.broadcast %81 : vector<1x256xf32> to vector<16x256xf32>
      %83 = arith.addf %80, %82 : vector<16x256xf32>
      %c0_40 = arith.constant 0 : index
      %c0_41 = arith.constant 0 : index
      %84 = vector.load %arg3[%c0_40, %c0_41] : memref<16x3xf32, #tpu.memory_space<vmem>>, vector<16x3xf32>
      %c0_42 = arith.constant 0 : index
      %c0_43 = arith.constant 0 : index
      %85 = vector.load %arg10[%c0_42, %c0_43] : memref<3x256xf32, #tpu.memory_space<vmem>>, vector<3x256xf32>
      %86 = vector.extract_strided_slice %84 {offsets = [0, 0], sizes = [16, 1], strides = [1, 1]} : vector<16x3xf32> to vector<16x1xf32>
      %87 = vector.extract_strided_slice %85 {offsets = [0, 0], sizes = [1, 256], strides = [1, 1]} : vector<3x256xf32> to vector<1x256xf32>
      %88 = vector.broadcast %86 : vector<16x1xf32> to vector<16x256xf32>
      %89 = vector.broadcast %87 : vector<1x256xf32> to vector<16x256xf32>
      %90 = arith.mulf %88, %89 : vector<16x256xf32>
      %91 = arith.addf %83, %90 : vector<16x256xf32>
      %92 = vector.extract_strided_slice %84 {offsets = [0, 1], sizes = [16, 1], strides = [1, 1]} : vector<16x3xf32> to vector<16x1xf32>
      %93 = vector.extract_strided_slice %85 {offsets = [1, 0], sizes = [1, 256], strides = [1, 1]} : vector<3x256xf32> to vector<1x256xf32>
      %94 = vector.broadcast %92 : vector<16x1xf32> to vector<16x256xf32>
      %95 = vector.broadcast %93 : vector<1x256xf32> to vector<16x256xf32>
      %96 = arith.mulf %94, %95 : vector<16x256xf32>
      %97 = arith.addf %91, %96 : vector<16x256xf32>
      %98 = vector.extract_strided_slice %84 {offsets = [0, 2], sizes = [16, 1], strides = [1, 1]} : vector<16x3xf32> to vector<16x1xf32>
      %99 = vector.extract_strided_slice %85 {offsets = [2, 0], sizes = [1, 256], strides = [1, 1]} : vector<3x256xf32> to vector<1x256xf32>
      %100 = vector.broadcast %98 : vector<16x1xf32> to vector<16x256xf32>
      %101 = vector.broadcast %99 : vector<1x256xf32> to vector<16x256xf32>
      %102 = arith.mulf %100, %101 : vector<16x256xf32>
      %103 = arith.addf %97, %102 : vector<16x256xf32>
      %cst_44 = arith.constant 0.000000e+00 : f32
      %104 = vector.broadcast %cst_44 : f32 to vector<16x256xf32>
      %105 = arith.maximumf %103, %104 : vector<16x256xf32>
      %106 = arith.truncf %105 : vector<16x256xf32> to vector<16x256xbf16>
      %c0_45 = arith.constant 0 : index
      %c0_46 = arith.constant 0 : index
      %107 = vector.load %arg17[%c0_45, %c0_46] : memref<16x256xbf16, #tpu.memory_space<vmem>>, vector<16x256xbf16>
      tpu.vector_store %arg17[%c0_45, %c0_46], %106 {strides = array<i32>} : memref<16x256xbf16, #tpu.memory_space<vmem>>, vector<16x256xbf16>,
    } else {
    }
    %c0 = arith.constant 0 : index
    %c0_1 = arith.constant 0 : index
    %3 = vector.load %arg17[%c0, %c0_1] : memref<16x256xbf16, #tpu.memory_space<vmem>>, vector<16x256xbf16>
    %c0_2 = arith.constant 0 : index
    %c0_3 = arith.constant 0 : index
    %4 = vector.load %arg13[%c0_2, %c0_3] : memref<256x256xbf16, #tpu.memory_space<vmem>>, vector<256x256xbf16>
    %cst = arith.constant dense<0.000000e+00> : vector<16x256xf32>
    %5 = tpu.matmul %3, %4, %cst {dimension_numbers = #tpu.dot_dimension_numbers<[1], [0], [0], [1], [0, 0, 1, 1], [], []>} : vector<16x256xbf16>, vector<256x256xbf16>, vector<16x256xf32> -> vector<16x256xf32>
    %c0_4 = arith.constant 0 : index
    %c0_5 = arith.constant 0 : index
    %6 = vector.load %arg14[%c0_4, %c0_5] : memref<1x256xf32, #tpu.memory_space<vmem>>, vector<1x256xf32>
    %7 = vector.broadcast %6 : vector<1x256xf32> to vector<16x256xf32>
    %8 = arith.addf %5, %7 : vector<16x256xf32>
    %9 = arith.negf %8 : vector<16x256xf32>
    %10 = math.exp %9 : vector<16x256xf32>
    %cst_6 = arith.constant 1.000000e+00 : f32
    %11 = vector.broadcast %cst_6 : f32 to vector<16x256xf32>
    %12 = arith.addf %11, %10 : vector<16x256xf32>
    %13 = arith.divf %11, %12 : vector<16x256xf32>
    %14 = arith.truncf %13 : vector<16x256xf32> to vector<16x256xbf16>
    %c0_7 = arith.constant 0 : index
    %c0_8 = arith.constant 0 : index
    %15 = vector.load %arg16[%c0_7, %c0_8] : memref<16x256xbf16, #tpu.memory_space<vmem>>, vector<16x256xbf16>
    tpu.vector_store %arg16[%c0_7, %c0_8], %14 {strides = array<i32>} : memref<16x256xbf16, #tpu.memory_space<vmem>>, vector<16x256xbf16>,
    return
  }
  func.func @transform_0(%arg0: i32) -> (i32, i32) {
    %c0_i32 = arith.constant 0 : i32
    %c0_i32_0 = arith.constant 0 : i32
    %c0_i32_1 = arith.constant 0 : i32
    return %c0_i32, %c0_i32_0 : i32, i32
  }
  func.func @transform_1(%arg0: i32) -> (i32, i32) {
    %c0_i32 = arith.constant 0 : i32
    %c0_i32_0 = arith.constant 0 : i32
    %c0_i32_1 = arith.constant 0 : i32
    return %c0_i32, %c0_i32_0 : i32, i32
  }
  func.func @transform_2(%arg0: i32) -> (i32, i32) {
    %c0_i32 = arith.constant 0 : i32
    %c0_i32_0 = arith.constant 0 : i32
    %c0_i32_1 = arith.constant 0 : i32
    return %c0_i32, %c0_i32_0 : i32, i32
  }
  func.func @transform_3(%arg0: i32) -> (i32, i32) {
    %c0_i32 = arith.constant 0 : i32
    %c0_i32_0 = arith.constant 0 : i32
    %c0_i32_1 = arith.constant 0 : i32
    return %c0_i32, %c0_i32_0 : i32, i32
  }
  func.func @transform_4(%arg0: i32) -> (i32, i32) {
    %c0_i32 = arith.constant 0 : i32
    %c0_i32_0 = arith.constant 0 : i32
    %c0_i32_1 = arith.constant 0 : i32
    return %c0_i32, %c0_i32_0 : i32, i32
  }
  func.func @transform_5(%arg0: i32) -> (i32, i32) {
    %c0_i32 = arith.constant 0 : i32
    %c0_i32_0 = arith.constant 0 : i32
    %c0_i32_1 = arith.constant 0 : i32
    return %c0_i32, %c0_i32_0 : i32, i32
  }
  func.func @transform_6(%arg0: i32) -> (i32, i32) {
    %c0_i32 = arith.constant 0 : i32
    %c0_i32_0 = arith.constant 0 : i32
    %c0_i32_1 = arith.constant 0 : i32
    return %c0_i32, %c0_i32_0 : i32, i32
  }
  func.func @transform_7(%arg0: i32) -> (i32, i32) {
    %c0_i32 = arith.constant 0 : i32
    %c0_i32_0 = arith.constant 0 : i32
    %c0_i32_1 = arith.constant 0 : i32
    return %c0_i32, %c0_i32_0 : i32, i32
  }
  func.func @transform_8(%arg0: i32) -> (i32, i32) {
    %c0_i32 = arith.constant 0 : i32
    %c0_i32_0 = arith.constant 0 : i32
    %c0_i32_1 = arith.constant 0 : i32
    return %c0_i32, %c0_i32_0 : i32, i32
  }
  func.func @transform_9(%arg0: i32) -> (i32, i32) {
    %c0_i32 = arith.constant 0 : i32
    %c0_i32_0 = arith.constant 0 : i32
    %c0_i32_1 = arith.constant 0 : i32
    return %c0_i32, %c0_i32_0 : i32, i32
  }
  func.func @transform_10(%arg0: i32) -> (i32, i32) {
    %c0_i32 = arith.constant 0 : i32
    %c0_i32_0 = arith.constant 0 : i32
    %c0_i32_1 = arith.constant 0 : i32
    return %c0_i32, %c0_i32_0 : i32, i32
  }
  func.func @transform_11(%arg0: i32) -> (i32, i32) {
    %c0_i32 = arith.constant 0 : i32
    %c0_i32_0 = arith.constant 0 : i32
    %c0_i32_1 = arith.constant 0 : i32
    return %c0_i32, %c0_i32_0 : i32, i32
  }
  func.func @transform_12(%arg0: i32) -> (i32, i32) {
    %c0_i32 = arith.constant 0 : i32
    %c0_i32_0 = arith.constant 0 : i32
    return %c0_i32, %arg0 : i32, i32
  }
  func.func @transform_13(%arg0: i32) -> (i32, i32) {
    %c0_i32 = arith.constant 0 : i32
    %c0_i32_0 = arith.constant 0 : i32
    return %c0_i32, %arg0 : i32, i32
  }
  func.func @transform_14(%arg0: i32) -> (i32, i32) {
    %c0_i32 = arith.constant 0 : i32
    %c0_i32_0 = arith.constant 0 : i32
    %c0_i32_1 = arith.constant 0 : i32
    return %c0_i32, %c0_i32_0 : i32, i32
  }
  func.func @transform_15(%arg0: i32) -> (i32, i32) {
    %c0_i32 = arith.constant 0 : i32
    %c0_i32_0 = arith.constant 0 : i32
    return %c0_i32, %arg0 : i32, i32
  }
}

</mosaic_0001>

<bundles_post_ra>
// kernel: tpu_custom_call.1
= control target key start
LH: loop header
LB: loop body
LE: loop exit
PB: predicated region body
PF: predicated region fallthrough
CT: control target
= control target key end

     0   :  { %s3613_s0 = inlined_call_operand.hbm [shape: bf16[32,768], index: 0, kind: input, shape index: {}]   ;;  %s3614_s1 = inlined_call_operand.vmem [shape: f32[32,3], index: 1, kind: input, shape index: {}]   ;;  %s3615_s2 = inlined_call_operand.vmem [shape: f32[16,3], index: 2, kind: input, shape index: {}]   ;;  %s3616_s3 = inlined_call_operand.vmem [shape: f32[8,32], index: 3, kind: input, shape index: {}]   ;;  %s3617_s4 = inlined_call_operand.hbm [shape: bf16[768,128], index: 4, kind: input, shape index: {}]   ;;  %s3618_s5 = inlined_call_operand.hbm [shape: f32[3,128], index: 5, kind: input, shape index: {}]   ;;  %s3619_s6 = inlined_call_operand.hbm [shape: f32[1,128], index: 6, kind: input, shape index: {}]   ;;  %s3620_s7 = inlined_call_operand.vmem [shape: bf16[128,128], index: 7, kind: input, shape index: {}]   ;;  %s3621_s8 = inlined_call_operand.hbm [shape: f32[1,128], index: 8, kind: input, shape index: {}]   ;;  %s3622_s9 = inlined_call_operand.vmem [shape: f32[3,256], index: 9, kind: input, shape index: {}]   ;;  %s3623_s10 = inlined_call_operand.hbm [shape: bf16[32,256], index: 10, kind: input, shape index: {}]   ;;  %s3624_s11 = inlined_call_operand.vmem [shape: f32[1,256], index: 11, kind: input, shape index: {}]   ;;  %s3625_s12 = inlined_call_operand.hbm [shape: bf16[256,768], index: 12, kind: input, shape index: {}]   ;;  %s3626_s13 = inlined_call_operand.vmem [shape: f32[1,768], index: 13, kind: input, shape index: {}]   ;;  %s3627_s14 = inlined_call_operand.hbm [shape: f32[8,128], index: 14, kind: output, shape index: {0}]   ;;  %s3628_s15 = inlined_call_operand.hbm [shape: bf16[16,768], index: 15, kind: output, shape index: {1}]  }
   0x1   :  { %3640 = sst [smem:[#allocation25_spill]] %s3613_s0 }
   0x2   :  { %3641 = sst [smem:[#allocation26_spill]] %s3614_s1 }
   0x3   :  { %3642 = sst [smem:[#allocation27_spill]] %s3615_s2 }
   0x4   :  { %3643 = sst [smem:[#allocation28_spill]] %s3616_s3 }
   0x5   :  { %3644 = sst [smem:[#allocation29_spill]] %s3617_s4 }
   0x6   :  { %3645 = sst [smem:[#allocation30_spill]] %s3620_s7 }
   0x7   :  { %3646 = sst [smem:[#allocation31_spill]] %s3622_s9 }
   0x8   :  { %3647 = sst [smem:[#allocation32_spill]] %s3624_s11 }
   0x9   :  { %3648 = sst [smem:[#allocation33_spill]] %s3627_s14 }
   0xa   :  { %3649 = sst [smem:[#allocation34_spill]] %s3628_s15 }
   0xb   :  { %21 = vsyncpa [#allocation4], 0 }
   0xc   :  { %22 = vsyncpa [#allocation7], 0 }
   0xd   :  { %23 = vsyncpa [#allocation10], 0 }
   0xe   :  { %24 = vsyncpa [#allocation13], 0 }
   0xf   :  { %25 = vsyncpa [#allocation5], 0 }
  0x10   :  { %26 = vsyncpa [#allocation17], 0 }
  0x11   :  { %28 = vsyncpa [#allocation17 + $0x1], 0  ;;  %s3110_s18 = smov 0   ;;  %s3112_s19 = smov 0  }
  0x12   :  { %s3114_s20 = smov 0   ;;  %s3116_s21 = smov 0  }
  0x13 LB: > { %s3006_s22 = smov [#allocation3]   ;;  %s3131_s24 = sadd.s32 4294967295, %s3004_s21   ;;  %s3004_s21 = sphi %s3116_s21, %s3694_s21   ;;  %s3000_s20 = sphi %s3114_s20, %s3693_s20   ;;  %s2996_s19 = sphi %s3112_s19, %s3692_s19   ;;  %s2992_s18 = sphi %s3110_s18, %s3691_s18  }
  0x14   : > { %s402_s23 = sshll.u32 %s3006_s22, 4  ;;  %p2145_p0 = scmp.ge.s32.totalorder %s3004_s21, 1  ;;  %s3137_s23 = int_to_ptr.vmem [resolvable:$true] %s402_s23 }
  0x15   : > { %p3633_p1 = scmp.eq.s32.totalorder %s3131_s24, 0  ;;  %p390_p2 = scmp.lt.s32.totalorder %s3004_s21, 4 }
  0x16   : > { %s3007_s26 = smov [#allocation6]   ;;  %s3008_s29 = smov [#allocation9]  }
  0x17   : > { %p3139_p4 = pnand %p2145_p0, %p390_p2  ;;  %s424_s27 = sshll.u32 %s3007_s26, 4  ;;  %s3151_s27 = int_to_ptr.vmem [resolvable:$true] %s424_s27 }
  0x18   : > { %s3153_s30 = sshll.u32 %s3008_s29, 4  ;;  %s3652_s0 = sld [smem:[#allocation25_spill]]  ;;  %s450_s30 = int_to_ptr.vmem [resolvable:$true] %s3153_s30 }
  0x19   : > { %s3650_s25 = scalar_select %p3139_p4, 1, 0 }
  0x1a   : > { %p2437_p5 = pneg %p3139_p4 }
  0x1c   : > { %p3147_p6 = pnand %p2437_p5, %p3633_p1 }
  0x1e   : > { %s2694_s22 = scalar_lea.hbm %s3652_s0, 1536  ;;  %p3163_p8 = pneg %p3147_p6 }
  0x1f   : > { %p2695_p7 = scmp.ne.s32.totalorder %s3652_s0, %s2694_s22  ;;  %p2701_p11 = scmp.lt.u32.totalorder %s2694_s22, %s3652_s0 }
  0x21   : > { %p2697_p9 = pnand %p3163_p8, %p2695_p7 }
  0x23   : > { %p2698_p10 = pneg %p2697_p9 }
  0x25   : > { %p2703_p12 = pnand %p2701_p11, %p2698_p10 }
  0x27   : > { %2706 = shalt.err (!%p2703_p12)
}
  0x28   : > { %s2707_s14 = scalar_lea.vmem %s3137_s23, 1536  ;;  %p2715_p5 = scmp.lt.s32.totalorder %s3137_s23, %s3137_s23 }
  0x29   : > { %p2708_p13 = scmp.ne.s32.totalorder %s3137_s23, %s2707_s14  ;;  %p2716_p3 = scmp.lt.s32.totalorder %s2707_s14, %s2707_s14 }
  0x2b   : > { %p2710_p0 = pnand %p2708_p13, %p3163_p8  ;;  %p2717_p7 = por %p2716_p3, %p2715_p5 }
  0x2d   : > { %p2711_p2 = pneg %p2710_p0 }
  0x2f   : > { %p2718_p9 = pnand %p2717_p7, %p2711_p2 }
  0x31   : > { %2721 = shalt.err (!%p2718_p9)
}
  0x32   : > { %s3635_s15 = smov 384   ;;  %s3010_s11 = smov 24  }
  0x33   : > { %2440 = dma.hbm_to_vmem [thread:$0]  (!%p3147_p6), %s3652_s0, 1536, %s3137_s23, [#allocation4], %s3635_s15, %s3635_s15, %s3010_s11  }
  0x34   : > { %s3654_s4 = sld [smem:[#allocation29_spill]] }
  0x3a   : > { %s2722_s9 = scalar_lea.hbm %s3654_s4, 6144 }
  0x3b   : > { %p2723_p3 = scmp.ne.s32.totalorder %s3654_s4, %s2722_s9  ;;  %p2729_p12 = scmp.lt.u32.totalorder %s2722_s9, %s3654_s4 }
  0x3d   : > { %p2725_p10 = pnand %p2723_p3, %p3163_p8 }
  0x3f   : > { %p2726_p11 = pneg %p2725_p10 }
  0x41   : > { %p2731_p13 = pnand %p2729_p12, %p2726_p11 }
  0x43   : > { %2734 = shalt.err (!%p2731_p13)
}
  0x44   : > { %s2735_s23 = scalar_lea.vmem %s3151_s27, 6144  ;;  %p2743_p7 = scmp.lt.s32.totalorder %s3151_s27, %s3151_s27 }
  0x45   : > { %p2736_p0 = scmp.ne.s32.totalorder %s3151_s27, %s2735_s23  ;;  %p2744_p9 = scmp.lt.s32.totalorder %s2735_s23, %s2735_s23 }
  0x47   : > { %p2738_p2 = pnand %p2736_p0, %p3163_p8  ;;  %p2745_p3 = por %p2744_p9, %p2743_p7 }
  0x49   : > { %p2739_p5 = pneg %p2738_p2 }
  0x4b   : > { %p2746_p10 = pnand %p2745_p3, %p2739_p5 }
  0x4d   : > { %2749 = shalt.err (!%p2746_p10)
}
  0x4e   : > { %s3011_s2 = smov 64   ;;  %s3012_s3 = smov 4  }
  0x4f   : > { %2443 = dma.hbm_to_vmem [thread:$0]  (!%p3147_p6), %s3654_s4, 6144, %s3151_s27, [#allocation7], %s3011_s2, %s3011_s2, %s3012_s3  }
  0x50   : > { %s2750_s17 = scalar_lea.hbm %s3619_s6, 16 }
  0x51   : > { %p2751_p11 = scmp.ne.s32.totalorder %s3619_s6, %s2750_s17  ;;  %p2757_p0 = scmp.lt.u32.totalorder %s2750_s17, %s3619_s6 }
  0x53   : > { %p2753_p12 = pnand %p2751_p11, %p3163_p8 }
  0x55   : > { %p2754_p13 = pneg %p2753_p12 }
  0x57   : > { %p2759_p2 = pnand %p2757_p0, %p2754_p13 }
  0x59   : > { %2762 = shalt.err (!%p2759_p2)
}
  0x5a   : > { %s2763_s7 = scalar_lea.vmem %s450_s30, 16  ;;  %s2770_s27 = scalar_lea.vmem %s450_s30, 32 }
  0x5b   : > { %p2764_p5 = scmp.ne.s32.totalorder %s450_s30, %s2763_s7  ;;  %p2771_p3 = scmp.lt.s32.totalorder %s450_s30, %s450_s30 }
  0x5c   : > { %p2772_p10 = scmp.lt.s32.totalorder %s2770_s27, %s2763_s7 }
  0x5d   : > { %p2766_p7 = pnand %p2764_p5, %p3163_p8 }
  0x5e   : > { %p2773_p1 = por %p2772_p10, %p2771_p3 }
  0x5f   : > { %p2767_p9 = pneg %p2766_p7 }
  0x61   : > { %p2774_p4 = pnand %p2773_p1, %p2767_p9 }
  0x63   : > { %2777 = shalt.err (!%p2774_p4)
}
  0x64   : > { %2449 = dma.hbm_to_vmem [thread:$0]  (!%p3147_p6), %s3619_s6, 16, %s450_s30, [#allocation10]  }
  0x65   : > { %s3013_s9 = smov [#allocation8]   ;;  %s3014_s16 = smov [#allocation11]  }
  0x66   : > { %s438_s11 = sshll.u32 %s3013_s9, 4  ;;  %s463_s17 = sshll.u32 %s3014_s16, 4  ;;  %s439_s11 = int_to_ptr.vmem [resolvable:$true] %s438_s11  ;;  %s464_s17 = int_to_ptr.vmem [resolvable:$true] %s463_s17 }
  0x67   : > { %s2778_s14 = scalar_lea.hbm %s3618_s5, 64 }
  0x68   : > { %p2779_p1 = scmp.ne.s32.totalorder %s3618_s5, %s2778_s14  ;;  %p2785_p12 = scmp.lt.u32.totalorder %s2778_s14, %s3618_s5 }
  0x6a   : > { %p2781_p4 = pnand %p2779_p1, %p3163_p8 }
  0x6c   : > { %p2782_p11 = pneg %p2781_p4 }
  0x6e   : > { %p2787_p13 = pnand %p2785_p12, %p2782_p11 }
  0x70   : > { %2790 = shalt.err (!%p2787_p13)
}
  0x71   : > { %s2791_s30 = scalar_lea.vmem %s439_s11, 64  ;;  %p2799_p7 = scmp.lt.s32.totalorder %s439_s11, %s439_s11 }
  0x72   : > { %p2792_p0 = scmp.ne.s32.totalorder %s439_s11, %s2791_s30  ;;  %p2800_p9 = scmp.lt.s32.totalorder %s2791_s30, %s2791_s30 }
  0x74   : > { %p2794_p2 = pnand %p2792_p0, %p3163_p8  ;;  %p2801_p3 = por %p2800_p9, %p2799_p7 }
  0x76   : > { %p2795_p5 = pneg %p2794_p2 }
  0x78   : > { %p2802_p10 = pnand %p2801_p3, %p2795_p5 }
  0x7a   : > { %2805 = shalt.err (!%p2802_p10)
}
  0x7b   : > { %2446 = dma.hbm_to_vmem [thread:$0]  (!%p3147_p6), %s3618_s5, 64, %s439_s11, [#allocation7]  }
  0x7c   : > { %s2806_s29 = scalar_lea.hbm %s3621_s8, 16 }
  0x7d   : > { %p2807_p1 = scmp.ne.s32.totalorder %s3621_s8, %s2806_s29  ;;  %p2813_p12 = scmp.lt.u32.totalorder %s2806_s29, %s3621_s8 }
  0x7f   : > { %p2809_p4 = pnand %p2807_p1, %p3163_p8 }
  0x81   : > { %p2810_p11 = pneg %p2809_p4 }
  0x83   : > { %p2815_p13 = pnand %p2813_p12, %p2810_p11 }
  0x85   : > { %2818 = shalt.err (!%p2815_p13)
}
  0x86   : > { %s2819_s2 = scalar_lea.vmem %s464_s17, 16  ;;  %s2826_s11 = scalar_lea.vmem %s464_s17, 32 }
  0x87   : > { %p2820_p0 = scmp.ne.s32.totalorder %s464_s17, %s2819_s2  ;;  %p2827_p7 = scmp.lt.s32.totalorder %s464_s17, %s464_s17 }
  0x88   : > { %p2828_p9 = scmp.lt.s32.totalorder %s2826_s11, %s2819_s2 }
  0x89   : > { %p2822_p2 = pnand %p2820_p0, %p3163_p8 }
  0x8a   : > { %p2829_p3 = por %p2828_p9, %p2827_p7 }
  0x8b   : > { %p2823_p5 = pneg %p2822_p2 }
  0x8d   : > { %p2830_p10 = pnand %p2829_p3, %p2823_p5 }
  0x8f   : > { %2833 = shalt.err (!%p2830_p10)
}
  0x90   : > { %2452 = dma.hbm_to_vmem [thread:$0]  (!%p3147_p6), %s3621_s8, 16, %s464_s17, [#allocation10]  }
  0x91   : > { %s3015_s9 = smov [#allocation12]   ;;  %s2834_s14 = scalar_lea.hbm %s3623_s10, 512 }
  0x92   : > { %s476_s16 = sshll.u32 %s3015_s9, 4  ;;  %p2835_p1 = scmp.ne.s32.totalorder %s3623_s10, %s2834_s14  ;;  %s477_s16 = int_to_ptr.vmem [resolvable:$true] %s476_s16 }
  0x93   : > { %p2841_p12 = scmp.lt.u32.totalorder %s2834_s14, %s3623_s10 }
  0x94   : > { %p2837_p4 = pnand %p2835_p1, %p3163_p8 }
  0x96   : > { %p2838_p11 = pneg %p2837_p4 }
  0x98   : > { %p2843_p13 = pnand %p2841_p12, %p2838_p11 }
  0x9a   : > { %2846 = shalt.err (!%p2843_p13)
}
  0x9b   : > { %s2847_s17 = scalar_lea.vmem %s477_s16, 512  ;;  %p2855_p7 = scmp.lt.s32.totalorder %s477_s16, %s477_s16 }
  0x9c   : > { %p2848_p0 = scmp.ne.s32.totalorder %s477_s16, %s2847_s17  ;;  %p2856_p9 = scmp.lt.s32.totalorder %s2847_s17, %s2847_s17 }
  0x9e   : > { %p2850_p2 = pnand %p2848_p0, %p3163_p8  ;;  %p2857_p3 = por %p2856_p9, %p2855_p7 }
  0xa0   : > { %p2851_p5 = pneg %p2850_p2 }
  0xa2   : > { %p2858_p10 = pnand %p2857_p3, %p2851_p5 }
  0xa4   : > { %2861 = shalt.err (!%p2858_p10)
}
  0xa5   : > { %s3636_s11 = smov 128   ;;  %s3637_s26 = smov 8  }
  0xa6   : > { %2455 = dma.hbm_to_vmem [thread:$0]  (!%p3147_p6), %s3623_s10, 512, %s477_s16, [#allocation13], %s3636_s11, %s3636_s11, %s3637_s26  }
  0xa7   : > { %s2144_s9 = sadd.s32 4294967294, %s3004_s21   ;;  %s3287_s22 = sadd.s32 1, %s3004_s21  }
  0xa8   : > { %s290_s29 = ssub.s32 %s3004_s21, %s3287_s22  ;;  %s293_s14 = sadd.s32 1, %s3000_s20 }
  0xa9   : > { %p291_p8 = scmp.eq.s32.totalorder %s290_s29, 0  ;;  %p300_p1 = scmp.ne.s32.totalorder %s3000_s20, %s2996_s19 }
  0xaa   : > { %p301_p4 = scmp.eq.s32.totalorder %s3004_s21, 0  ;;  %p306_p11 = scmp.ne.s32.totalorder %s2996_s19, %s2992_s18 }
  0xab   : > { %s3298_s28 = scalar_select %p291_p8, %s3000_s20, %s293_s14  }
  0xac   : > { %p3300_p12 = por %p301_p4, %p300_p1  ;;  %p3656_p6 = scmp.eq.s32.totalorder %s3131_s24, 0 }
  0xad   : > { %p3638_p0 = scmp.eq.s32.totalorder %s3131_s24, 2  ;;  %p383_p2 = scmp.eq.s32.totalorder %s2144_s9, 2 }
  0xae   : > { %p3306_p13 = por %p3656_p6, %p306_p11  ;;  %p2470_p5 = scmp.lt.s32.totalorder %s3004_s21, 3 }
  0xaf   : > { %s493_s7 = sand.u32 1, %s3004_s21   ;;  %p3315_p7 = por %p3638_p0, %p300_p1 }
  0xb0   : > { %p3319_p9 = por %p383_p2, %p306_p11  ;;  %s495_s17 = sand.u32 1, %s3000_s20  }
  0xb1   : > { %s3658_s27 = scalar_select %p3315_p7, 1, 0 }
  0xb2   : > { %s3659_s2 = scalar_select %p3319_p9, 1, 0 }
  0xb3   : > { %s2153_s30 = sshll.u32 %s495_s17, 8  ;;  %s2287_s3 = sshll.u32 %s3004_s21, 7 }
  0xb4   : > { %s3328_s15 = scalar_lea.hbm %s3625_s12, %s2287_s3  ;;  %s497_s9 = scalar_lea.vmem [#allocation14], %s2153_s30 }
  0xb5   : > { %s504_s11 = sshll.u32 %s497_s9, 4  ;;  %p3332_p3 = pnand %p2470_p5, %p3300_p12  ;;  %s3336_s11 = int_to_ptr.vmem [resolvable:$true] %s504_s11 }
  0xb6   : > { %s3338_s17 = scalar_lea.sflag [#allocation4], %s493_s7  ;;  %s2862_s29 = scalar_lea.hbm %s3328_s15, 4096 }
  0xb7   : > { %p2863_p10 = scmp.ne.s32.totalorder %s3328_s15, %s2862_s29  ;;  %p2864_p8 = pneg %p3332_p3 }
  0xb8   : > { %s2867_s3 = scalar_lea.hbm %s3625_s12, 12288  ;;  %p2868_p11 = scmp.lt.u32.totalorder %s3328_s15, %s3625_s12 }
  0xb9   : > { %p2865_p1 = pnand %p2864_p8, %p2863_p10  ;;  %p2869_p12 = scmp.lt.u32.totalorder %s2867_s3, %s2862_s29 }
  0xba   : > { %p2871_p2 = scmp.lt.u32.totalorder %s2862_s29, %s3328_s15 }
  0xbb   : > { %p2866_p4 = pneg %p2865_p1  ;;  %p2870_p6 = por %p2869_p12, %p2868_p11 }
  0xbd   : > { %p2872_p5 = por %p2871_p2, %p2870_p6 }
  0xbf   : > { %p2873_p0 = pnand %p2872_p5, %p2866_p4 }
  0xc1   : > { %2876 = shalt.err (!%p2873_p0)
}
  0xc2   : > { %s2877_s7 = scalar_lea.vmem %s3336_s11, 4096  ;;  %s3018_s30 = smov [#allocation14]  }
  0xc3   : > { %p2878_p10 = scmp.ne.s32.totalorder %s3336_s11, %s2877_s7  ;;  %s2882_s23 = sshll.u32 %s3018_s30, 4  ;;  %s2883_s23 = int_to_ptr.vmem [resolvable:$false] %s2882_s23 }
  0xc4   : > { %s2884_s14 = scalar_lea.vmem %s2883_s23, 8192  ;;  %p2885_p7 = scmp.lt.s32.totalorder %s3336_s11, %s2883_s23 }
  0xc5   : > { %p2880_p1 = pnand %p2878_p10, %p2864_p8  ;;  %p2886_p11 = scmp.lt.s32.totalorder %s2884_s14, %s2877_s7 }
  0xc7   : > { %p2881_p9 = pneg %p2880_p1  ;;  %p2887_p12 = por %p2886_p11, %p2885_p7 }
  0xc9   : > { %p2888_p6 = pnand %p2887_p12, %p2881_p9 }
  0xcb   : > { %2891 = shalt.err (!%p2888_p6)
}
  0xcc   : > { %s3661_s29 = smov 8   ;;  %s3662_s3 = smov 128  }
  0xcd   : > { %s3663_s9 = smov 384   ;;  %p3664_p0 = scmp.ne.s32.totalorder %s3650_s25, 0 }
  0xce   : > { %2459 = dma.hbm_to_vmem [thread:$0]  (!%p3332_p3), %s3328_s15, 4096, %s3336_s11, %s3338_s17, %s3663_s9, %s3662_s3, %s3661_s29  }
  0xcf   : > { %524 = sbr.rel (%p3664_p0) target bundleno = 1472 (0x5c0), region = 76  ;;  %p3665_p8 = scmp.eq.s32.totalorder (!%p3664_p0), %s3131_s24, 0 }
  0xd6   : > { %2963 = dma.done.wait (%p3665_p8), [#allocation4], 1536   ;;  %p3666_p4 = pmov %p3665_p8 }
  0xd8   : > { %2965 = vsyncadd (%p3666_p4), [#allocation4], 4294965760  ;;  %p3667_p7 = pmov %p3666_p4 }
  0xd9   : > { %p3668_p9 = pmov %p3666_p4 }
  0xda   : > { %2967 = dma.done.wait (%p3667_p7), [#allocation7], 6208  }
  0xdb   : > { %2969 = vsyncadd (%p3668_p9), [#allocation7], 4294961088  ;;  %p3669_p2 = pmov %p3666_p4 }
  0xdd   : > { %2971 = dma.done.wait (%p3669_p2), [#allocation10], 32   ;;  %p3670_p3 = pmov %p3669_p2 }
  0xde   : > { %p3671_p5 = pmov %p3669_p2 }
  0xdf   : > { %2973 = vsyncadd (%p3670_p3), [#allocation10], 4294967264 }
  0xe0   : > { %2975 = dma.done.wait (%p3671_p5), [#allocation13], 512   ;;  %p3672_p10 = pmov %p3669_p2 }
  0xe1   : > { %s550_s25 = sand.u32 1, %s3131_s24   ;;  %s3389_s15 = sand.u32 1, %s2996_s19  }
  0xe2   : > { %2977 = vsyncadd (%p3672_p10), [#allocation13], 4294966784  ;;  %s2163_s11 = sshll.u32 %s3389_s15, 8  ;;  %s551_s26 = scalar_lea.sflag [#allocation4], %s550_s25 }
  0xe3   : > { %s3392_s17 = scalar_lea.vmem [#allocation14], %s2163_s11 }
  0xe4   : > { %2979 = dma.done.wait (%p3306_p13), %s551_s26, 4096  }
  0xe5   : > { %2981 = vsyncadd (%p3306_p13), %s551_s26, 4294963200  ;;  %s2164_s7 = sshll.u32 %s3389_s15, 4  ;;  %s2165_s30 = sshll.u32 %s3131_s24, 1 }
  0xe6   : > { %p607_p1 = scmp.lt.s32.totalorder %s2165_s30, 5  ;;  %s3406_s3 = scalar_lea.vmem [#allocation16], %s2164_s7 }
  0xe7   : > { %p3673_p11 = scmp.ne.s32.totalorder %s3131_s24, 0 }
  0xe8   : > { %s3696_s30 = smov (!%p607_p1, %s2165_s30), 5  ;;  %v2546_v0 = vld [vmem:[#allocation6 + $0x40] sm:$0xff] (!%p3673_p11)   ;;  %v3019_v2 = vmov (!%p3673_p11), 0   ;;  %v2550_v5 = vld [vmem:[#allocation6 + $0x48] sm:$0xff] (!%p3673_p11)   ;;  %v2554_v9 = vld [vmem:[#allocation6 + $0x50] sm:$0xff] (!%p3673_p11)   ;;  %s3674_s1 = sld [smem:[#allocation26_spill]] (!%p3673_p11) }
  0xe9   : > { %616 = sbr.rel (%p3673_p11) target bundleno = 1141 (0x475), region = 108  ;;  %v2547_v1 = vld [vmem:[#allocation6] sm:$0xff] (!%p3673_p11)   ;;  %2535 = vset.pattern.permute.xlu1 (!%p3673_p11), %v3019_v2  ;;  %2534 = vset.pattern.permute.xlu0 (!%p3673_p11), %v3019_v2  ;;  %v2551_v6 = vld [vmem:[#allocation6 + $0x8] sm:$0xff] (!%p3673_p11)   ;;  %v2555_v10 = vld [vmem:[#allocation6 + $0x10] sm:$0xff] (!%p3673_p11)   ;;  %v3020_v63 = vmov (!%p3673_p11), 1   ;;  %s3675_s25 = sld [smem:[#allocation30_spill]] (!%p3673_p11) }
  0xea   : > { %2291 = vmatprep.subr.bf16.mxu0 (!%p3673_p11), %v2546_v0  ;;  %v2548_v3 = vld [vmem:[#allocation6 + $0xc0] sm:$0xff] (!%p3673_p11)   ;;  %v2552_v7 = vld [vmem:[#allocation6 + $0xc8] sm:$0xff] (!%p3673_p11)   ;;  %v2556_v11 = vld [vmem:[#allocation6 + $0xd0] sm:$0xff] (!%p3673_p11)   ;;  %s3676_s0 = sld [smem:[#allocation28_spill]] (!%p3673_p11)  ;;  %s3022_s11 = smov (!%p3673_p11), 32   ;;  %vm1474_vm0 = vcmask (!%p3673_p11), 261120  }
  0xeb   : > { %2292 = vmatpush3.bf16.msra.mxu0 (!%p3673_p11), %v2547_v1  ;;  %v2549_v4 = vld [vmem:[#allocation6 + $0x80] sm:$0xff] (!%p3673_p11)   ;;  %2319 = vmatprep.subr.bf16.mxu1 (!%p3673_p11), %v2548_v3  ;;  %v2553_v8 = vld [vmem:[#allocation6 + $0x88] sm:$0xff] (!%p3673_p11)   ;;  %v2557_v12 = vld [vmem:[#allocation6 + $0x90] sm:$0xff] (!%p3673_p11)   ;;  %v3021_v3 = vmov (!%p3673_p11), 2   ;;  %s3677_s7 = sld [smem:[#allocation27_spill]] (!%p3673_p11)  ;;  %s3023_s14 = smov (!%p3673_p11), 96  }
  0xec   : > { %2320 = vmatpush3.bf16.msra.mxu1 (!%p3673_p11), %v2549_v4  ;;  %2293 = vmatprep.subr.bf16.mxu0 (!%p3673_p11), %v2550_v5  ;;  %v2558_v13 = vld [vmem:[#allocation6 + $0x58] sm:$0xff] (!%p3673_p11)   ;;  %v2562_v17 = vld [vmem:[#allocation6 + $0x60] sm:$0xff] (!%p3673_p11)   ;;  %v2566_v21 = vld [vmem:[#allocation6 + $0x68] sm:$0xff] (!%p3673_p11)   ;;  %s3024_s16 = smov (!%p3673_p11), 64   ;;  %vm1476_vm1 = vcmask (!%p3673_p11), 523264   ;;  %vm1478_vm2 = vcmask (!%p3673_p11), 785408  }
  0xed   : > { %2321 = vmatprep.subr.bf16.mxu1 (!%p3673_p11), %v2552_v7  ;;  %v2559_v14 = vld [vmem:[#allocation6 + $0x18] sm:$0xff] (!%p3673_p11)   ;;  %v2563_v18 = vld [vmem:[#allocation6 + $0x20] sm:$0xff] (!%p3673_p11)   ;;  %v2567_v22 = vld [vmem:[#allocation6 + $0x28] sm:$0xff] (!%p3673_p11)   ;;  %s3679_s29 = sld [smem:[#allocation32_spill]] (!%p3673_p11) }
  0xee   : > { %v2560_v15 = vld [vmem:[#allocation6 + $0xd8] sm:$0xff] (!%p3673_p11)   ;;  %v2564_v19 = vld [vmem:[#allocation6 + $0xe0] sm:$0xff] (!%p3673_p11)   ;;  %v2568_v23 = vld [vmem:[#allocation6 + $0xe8] sm:$0xff] (!%p3673_p11)  }
  0xef   : > { %2294 = vmatpush3.bf16.msra.mxu0 (!%p3673_p11), %v2551_v6  ;;  %v2561_v16 = vld [vmem:[#allocation6 + $0x98] sm:$0xff] (!%p3673_p11)   ;;  %v2565_v20 = vld [vmem:[#allocation6 + $0xa0] sm:$0xff] (!%p3673_p11)   ;;  %v2569_v24 = vld [vmem:[#allocation6 + $0xa8] sm:$0xff] (!%p3673_p11)  }
  0xf0   : > { %2322 = vmatpush3.bf16.msra.mxu1 %v2553_v8  ;;  %2295 = vmatprep.subr.bf16.mxu0 %v2554_v9  ;;  %v2570_v25 = vld [vmem:[#allocation6 + $0x70] sm:$0xff]   ;;  %v2574_v29 = vld [vmem:[#allocation6 + $0x78] sm:$0xff]   ;;  %v2581_v35 = vld [vmem:[#allocation6 + $0x140] sm:$0xff]  }
  0xf1   : > { %2323 = vmatprep.subr.bf16.mxu1 %v2556_v11  ;;  %v2571_v26 = vld [vmem:[#allocation6 + $0x30] sm:$0xff]   ;;  %v2575_v30 = vld [vmem:[#allocation6 + $0x38] sm:$0xff]   ;;  %v2582_v36 = vld [vmem:[#allocation3 + $0x8] ss:$24 sps:$4 sm:$0xff]  }
  0xf2   : > { %v2572_v27 = vld [vmem:[#allocation6 + $0xf0] sm:$0xff]   ;;  %v2576_v31 = vld [vmem:[#allocation6 + $0xf8] sm:$0xff]   ;;  %v2584_v37 = vld [vmem:[#allocation3 + $0xc] ss:$24 sps:$4 sm:$0xff]  }
  0xf3   : > { %2296 = vmatpush3.bf16.msra.mxu0 %v2555_v10  ;;  %v2573_v28 = vld [vmem:[#allocation6 + $0xb0] sm:$0xff]   ;;  %v2577_v32 = vld [vmem:[#allocation3] ss:$24 sps:$4 sm:$0xff]   ;;  %v2579_v33 = vld [vmem:[#allocation3 + $0x4] ss:$24 sps:$4 sm:$0xff]   ;;  %1161 = vmatprep.mubr.bf16.mxu1 %v2584_v37 }
  0xf4   : > { %2324 = vmatpush3.bf16.msra.mxu1 %v2557_v12  ;;  %2297 = vmatprep.subr.bf16.mxu0 %v2558_v13  ;;  %v2580_v34 = vld [vmem:[#allocation6 + $0xb8] sm:$0xff]   ;;  %v2585_v38 = vld [vmem:[#allocation6 + $0x100] sm:$0xff]   ;;  %v2586_v39 = vld [vmem:[#allocation6 + $0x148] sm:$0xff]  }
  0xf5   : > { %2325 = vmatprep.subr.bf16.mxu1 %v2560_v15  ;;  %1112 = vmatprep.mubr.bf16.mxu0 %v2579_v33  ;;  %v2587_v40 = vld [vmem:[#allocation6 + $0x108] sm:$0xff]   ;;  %v2588_v41 = vld [vmem:[#allocation6 + $0x150] sm:$0xff]   ;;  %v2590_v43 = vld [vmem:[#allocation6 + $0x158] sm:$0xff]  }
  0xf6   : > { %v2589_v42 = vld [vmem:[#allocation6 + $0x110] sm:$0xff]   ;;  %v2591_v45 = vld [vmem:[#allocation6 + $0x118] sm:$0xff]   ;;  %v2592_v47 = vld [vmem:[#allocation6 + $0x160] sm:$0xff]  }
  0xf7   : > { %2298 = vmatpush3.bf16.msra.mxu0 %v2559_v14  ;;  %v2594_v44 = vld [vmem:[#allocation3 + $0x34] ss:$24 sps:$4 sm:$0xff]   ;;  %v2597_v46 = vld [vmem:[#allocation3 + $0x30] ss:$24 sps:$4 sm:$0xff]   ;;  %v2593_v50 = vld [vmem:[#allocation6 + $0x120] sm:$0xff]  }
  0xf8   : > { %2326 = vmatpush3.bf16.msra.mxu1 %v2561_v16  ;;  %2299 = vmatprep.subr.bf16.mxu0 %v2562_v17  ;;  %v2599_v48 = vld [vmem:[#allocation3 + $0x3c] ss:$24 sps:$4 sm:$0xff]   ;;  %v2601_v49 = vld [vmem:[#allocation3 + $0x38] ss:$24 sps:$4 sm:$0xff]   ;;  %v2596_v51 = vld [vmem:[#allocation6 + $0x168] sm:$0xff]  }
  0xf9   : > { %2327 = vmatprep.subr.bf16.mxu1 %v2564_v19  ;;  %v2598_v52 = vld [vmem:[#allocation6 + $0x128] sm:$0xff]   ;;  %v2602_v54 = vld [vmem:[#allocation6 + $0x170] sm:$0xff]   ;;  %v1229_v56 = vld [vmem:[%s3674_s1 + $0x10] sm:$0xff] }
  0xfa   : > { %v2608_v53 = vld [vmem:[#allocation3 + $0x14] ss:$24 sps:$4 sm:$0xff]   ;;  %v2604_v58 = vld [vmem:[#allocation6 + $0x178] sm:$0xff]   ;;  %1244 = vperm.xlu1 %2535, %v1229_v56   ;;  %v2606_v62 = vld [vmem:[#allocation3 + $0x10] ss:$24 sps:$4 sm:$0xff]  }
  0xfb   : > { %2300 = vmatpush3.bf16.msra.mxu0 %v2563_v18  ;;  %v2603_v55 = vld [vmem:[#allocation6 + $0x130] sm:$0xff]   ;;  %v1230_v59 = vld [vmem:[%s3674_s1 + $0x18] sm:$0xff]  ;;  %v1228_v60 = vld [vmem:[%s3674_s1 + $0x8] sm:$0xff] }
  0xfc   : > { %2328 = vmatpush3.bf16.msra.mxu1 %v2565_v20  ;;  %2301 = vmatprep.subr.bf16.mxu0 %v2566_v21  ;;  %v1227_v57 = vld [vmem:[%s3674_s1] sm:$0xff]  ;;  %v2605_v61 = vld [vmem:[#allocation6 + $0x138] sm:$0xff]   ;;  %v2614_v6 = vld [vmem:[%s3675_s25 + $0x10] sm:$0xff]  }
  0xfd   : > { %2329 = vmatprep.subr.bf16.mxu1 %v2568_v23  ;;  %1234 = vperm.xlu0 %2534, %v1227_v57   ;;  %v2609_v0 = vld [vmem:[#allocation3 + $0x44] ss:$24 sps:$4 sm:$0xff]   ;;  %v2611_v1 = vld [vmem:[#allocation3 + $0x40] ss:$24 sps:$4 sm:$0xff]   ;;  %v2612_v4 = vld [vmem:[%s3675_s25] sm:$0xff]  }
  0xfe   : > { %1249 = vperm.xlu1 %2535, %v1230_v59   ;;  %v2613_v5 = vld [vmem:[%s3675_s25 + $0x8] sm:$0xff]   ;;  %v2615_v7 = vld [vmem:[%s3675_s25 + $0x18] sm:$0xff]   ;;  %v2616_v8 = vld [vmem:[%s3675_s25 + $0x20] sm:$0xff]  }
  0xff   : > { %2302 = vmatpush3.bf16.msra.mxu0 %v2567_v22  ;;  %v2617_v9 = vld [vmem:[%s3675_s25 + $0x28] sm:$0xff]   ;;  %v2618_v10 = vld [vmem:[%s3675_s25 + $0x30] sm:$0xff]   ;;  %v2619_v11 = vld [vmem:[%s3675_s25 + $0x38] sm:$0xff]  }
 0x100   : > { %2330 = vmatpush3.bf16.msra.mxu1 %v2569_v24  ;;  %2303 = vmatprep.subr.bf16.mxu0 %v2570_v25  ;;  %v1459_v12 = vld [vmem:[%s3676_s0] sm:$0xff]  ;;  %v2167_v14 = vld [vmem:[#allocation9] ss:$0 sm:$0xff]  ;;  %s3678_s0 = sld [smem:[#allocation31_spill]] }
 0x101   : > { %2331 = vmatprep.subr.bf16.mxu1 %v2572_v27  ;;  %1239 = vperm.xlu0 %2534, %v1228_v60  }
 0x102   : > { %2537 = vset.pattern.permute.xlu1 %v3020_v63 }
 0x103   : > { %2304 = vmatpush3.bf16.msra.mxu0 %v2571_v26  ;;  %1269 = vperm.xlu1 %2537, %v1228_v60  }
 0x104   : > { %2332 = vmatpush3.bf16.msra.mxu1 %v2573_v28  ;;  %2305 = vmatprep.subr.bf16.mxu0 %v2574_v29 }
 0x105   : > { %2333 = vmatprep.subr.bf16.mxu1 %v2576_v31  ;;  %2536 = vset.pattern.permute.xlu0 %v3020_v63 }
 0x106   : > { %1265 = vperm.xlu0 %2536, %v1227_v57  }
 0x107   : > { %2306 = vmatpush3.bf16.msra.mxu0 %v2575_v30  ;;  %1273 = vperm.xlu1 %2537, %v1229_v56  }
 0x108   : > { %2334 = vmatpush3.bf16.msra.mxu1 %v2580_v34  ;;  %2347 = vmatprep.subr.bf16.mxu0 %v2581_v35 }
 0x109   : > { %2385 = vmatprep.subr.bf16.mxu1 %v2612_v4 }
 0x10a   : > { %1113 = vmatmul.mubr.bf16.vlgmr.msra.gmra.mrb[0].mxu0 %v2577_v32  ;;  %1277 = vperm.xlu0 %2536, %v1230_v59  }
 0x10b   : > { %2348 = vmatpush3.bf16.msra.mxu0 %v2585_v38  ;;  %1162 = vmatmul.mubr.bf16.vlgmr.msra.gmra.mrb[0].mxu1 %v2582_v36 }
 0x10c   : > { %2349 = vmatprep.subr.bf16.mxu0 %v2586_v39  ;;  %1120 = vmatprep.mubr.bf16.mxu0 %v2594_v44 }
 0x10d   : > { %1169 = vmatprep.mubr.bf16.mxu1 %v2599_v48  ;;  %2538 = vset.pattern.permute.xlu1 %v3021_v3 }
 0x10e   : > { %1293 = vperm.xlu1 %2538, %v1227_v57   ;;  %2539 = vset.pattern.permute.xlu0 %v3021_v3 }
 0x10f   : > { %2350 = vmatpush3.bf16.msra.mxu0 %v2587_v40  ;;  %1297 = vperm.xlu0 %2539, %v1228_v60  }
 0x110   : > { %2351 = vmatprep.subr.bf16.mxu0 %v2588_v41  ;;  %2386 = vmatpush3.bf16.msra.mxu1 %v2612_v4 }
 0x111   : > { %2387 = vmatprep.subr.bf16.mxu1 %v2613_v5 }
 0x112   : > { %1121 = vmatmul.mubr.bf16.gmra.mrb[4].mxu0 %v2597_v46  ;;  %1301 = vperm.xlu1 %2538, %v1229_v56  }
 0x113   : > { %2352 = vmatpush3.bf16.msra.mxu0 %v2589_v42  ;;  %1170 = vmatmul.mubr.bf16.gmra.mrb[4].mxu1 %v2601_v49 }
 0x114   : > { %2353 = vmatprep.subr.bf16.mxu0 %v2590_v43  ;;  %1210 = vmatprep.mubr.bf16.mxu0 %v2608_v53 }
 0x115   : > { %2540 = vset.pattern.permute.xlu0 %v3019_v2  ;;  %2388 = vmatpush3.bf16.msra.mxu1 %v2613_v5 }
 0x116   : > { %1305 = vperm.xlu1 %2538, %v1230_v59   ;;  %2389 = vmatprep.subr.bf16.mxu1 %v2614_v6 }
 0x117   : > { %2354 = vmatpush3.bf16.msra.mxu0 %v2591_v45  ;;  %1461 = vrot.lane.b32.xlu0 %v1459_v12, %s3022_s11 }
 0x118   : > { %2355 = vmatprep.subr.bf16.mxu0 %v2592_v47 }
 0x119   : > { %2390 = vmatpush3.bf16.msra.mxu1 %v2614_v6 }
 0x11a   : > { %2541 = vset.pattern.permute.xlu1 %v3019_v2  ;;  %2391 = vmatprep.subr.bf16.mxu1 %v2615_v7 }
 0x11b   : > { %2356 = vmatpush3.bf16.msra.mxu0 %v2593_v50  ;;  %v1252_v50 = vlaneseq }
 0x11c   : > { %2357 = vmatprep.subr.bf16.mxu0 %v2596_v51 }
 0x11d   : > { %2392 = vmatpush3.bf16.msra.mxu1 %v2615_v7  ;;  %v3457_v53 = vshrl.u32 %v1252_v50, 7 }
 0x11e   : > { %2393 = vmatprep.subr.bf16.mxu1 %v2616_v8 }
 0x11f   : > { %2358 = vmatpush3.bf16.msra.mxu0 %v2598_v52  ;;  %v3463_v56 = vsub.s32 1, %v3457_v53  ;;  %v3466_v57 = vsub.s32 2, %v3457_v53 }
 0x120   : > { %2359 = vmatprep.subr.bf16.mxu0 %v2602_v54 }
 0x121   : > { %2394 = vmatpush3.bf16.msra.mxu1 %v2616_v8 }
 0x122   : > { %2395 = vmatprep.subr.bf16.mxu1 %v2617_v9 }
 0x123   : > { %2360 = vmatpush3.bf16.msra.mxu0 %v2603_v55  ;;  %v3460_v55 = vsub.s32 0, %v3457_v53 }
 0x124   : > { %2361 = vmatprep.subr.bf16.mxu0 %v2604_v58  ;;  %v1231_v58 = vld [vmem:[#allocation8] sm:$0x7] }
 0x125   : > { %2396 = vmatpush3.bf16.msra.mxu1 %v2617_v9 }
 0x126   : > { %2397 = vmatprep.subr.bf16.mxu1 %v2618_v10 }
 0x127   : > { %2362 = vmatpush3.bf16.msra.mxu0 %v2605_v61 }
 0x129   : > { %2398 = vmatpush3.bf16.msra.mxu1 %v2618_v10 }
 0x12a   : > { %1211 = vmatmul.mubr.bf16.vlgmr.msra.gmra.mrb[8].mxu0 %v2606_v62  ;;  %2399 = vmatprep.subr.bf16.mxu1 %v2619_v11  ;;  %v1255_v62 = vrot.slane %v1231_v58, %v3460_v55 }
 0x12b   : > { %1218 = vmatprep.mubr.bf16.mxu0 %v2609_v0  ;;  %v1283_v0 = vrot.slane %v1231_v58, %v3463_v56 }
 0x12d   : > { %2400 = vmatpush3.bf16.msra.mxu1 %v2619_v11 }
 0x132   : > { %1219 = vmatmul.mubr.bf16.gmra.mrb[12].mxu0 %v2611_v1  ;;  %v1311_v1 = vrot.slane %v1231_v58, %v3466_v57 }
 0x179   : > { %v1245_v30 = vpop.permute.xlu1 %1244 }
 0x17c   : > { %v1235_v35 = vpop.permute.xlu0 %1234 }
 0x17d   : > { %v1250_v43 = vpop.permute.xlu1 %1249  ;;  %v1256_v8 = vmul.f32 %v1255_v62, %v1235_v35 }
 0x17e   : > { %v1259_v35 = vmul.f32 %v1255_v62, %v1250_v43  ;;  %v1564_v43 = vld [vmem:[%s3677_s7] sm:$0xff] }
 0x17f   : > { %1569 = vperm.xlu0 %2540, %v1564_v43  }
 0x180   : > { %v1240_v48 = vpop.permute.xlu0 %1239 }
 0x182   : > { %v1270_v51 = vpop.permute.xlu1 %1269 }
 0x183   : > { %2543 = vset.pattern.permute.xlu0 %v3020_v63 }
 0x185   : > { %v1266_v52 = vpop.permute.xlu0 %1265 }
 0x186   : > { %v1274_v54 = vpop.permute.xlu1 %1273  ;;  %v1284_v9 = vmul.f32 %v1283_v0, %v1266_v52 }
 0x189   : > { %v1278_v59 = vpop.permute.xlu0 %1277 }
 0x18d   : > { %v1294_v6 = vpop.permute.xlu1 %1293 }
 0x18e   : > { %v1298_v12 = vpop.permute.xlu0 %1297 }
 0x1dd   : > { %v2307_v13 = vpop.f32.mrb[0].mxu0 }
 0x1de   : > { %v2308_v15 = vpop.f32.mrb[1].mxu0  ;;  %v2335_v18 = vpop.f32.mrb[0].mxu1 }
 0x1df   : > { %v2309_v16 = vadd.f32 %v2308_v15, %v2307_v13  ;;  %v2310_v17 = vpop.f32.mrb[2].mxu0  ;;  %v2336_v22 = vpop.f32.mrb[1].mxu1  ;;  %v1257_v13 = vmul.f32 %v1255_v62, %v1240_v48 }
 0x1e0   : > { %v2311_v19 = vpop.f32.mrb[3].mxu0  ;;  %v2337_v23 = vadd.f32 %v2336_v22, %v2335_v18  ;;  %v2338_v24 = vpop.f32.mrb[2].mxu1 }
 0x1e1   : > { %v1115_v20 = vadd.f32 %v2309_v16, %v2167_v14  ;;  %v2312_v21 = vadd.f32 %v2311_v19, %v2310_v17  ;;  %v2339_v26 = vpop.f32.mrb[3].mxu1  ;;  %v1285_v17 = vmul.f32 %v1283_v0, %v1270_v51  ;;  %v1302_v22 = vpop.permute.xlu1 %1301 }
 0x1e2   : > { %v2340_v28 = vadd.f32 %v2339_v26, %v2338_v24 }
 0x1e3   : > { %v1118_v25 = vadd.f32 %v2312_v21, %v2167_v14  ;;  %v1164_v27 = vadd.f32 %v2337_v23, %v1115_v20  ;;  %v1313_v21 = vmul.f32 %v1311_v1, %v1298_v12 }
 0x1e5   : > { %v1167_v29 = vadd.f32 %v2340_v28, %v1118_v25  ;;  %v2313_v31 = vpop.f32.mrb[4].mxu0 }
 0x1e6   : > { %v2314_v32 = vpop.f32.mrb[5].mxu0  ;;  %v2341_v36 = vpop.f32.mrb[4].mxu1 }
 0x1e7   : > { %v2315_v33 = vadd.f32 %v2314_v32, %v2313_v31  ;;  %v2316_v34 = vpop.f32.mrb[6].mxu0  ;;  %v2342_v40 = vpop.f32.mrb[5].mxu1  ;;  %v1258_v32 = vmul.f32 %v1255_v62, %v1245_v30  ;;  %v2228_v62 = vld [vmem:[#allocation11] ss:$0 sm:$0xff] }
 0x1e8   : > { %v2317_v37 = vpop.f32.mrb[7].mxu0  ;;  %v2343_v41 = vadd.f32 %v2342_v40, %v2341_v36  ;;  %v2344_v42 = vpop.f32.mrb[6].mxu1  ;;  %v1286_v36 = vmul.f32 %v1283_v0, %v1274_v54  ;;  %v1287_v40 = vmul.f32 %v1283_v0, %v1278_v59  ;;  %v2622_v54 = vld [vmem:[#allocation12 + $0x4] ss:$8 sps:$4 sm:$0xff]   ;;  %v2625_v59 = vld [vmem:[#allocation12 + $0x14] ss:$8 sps:$4 sm:$0xff]  }
 0x1e9   : > { %v1123_v38 = vadd.f32 %v2315_v33, %v2167_v14  ;;  %v2318_v39 = vadd.f32 %v2317_v37, %v2316_v34  ;;  %v2345_v45 = vpop.f32.mrb[7].mxu1  ;;  %1509 = vmatprep.subr.bf16.mxu1 %v2622_v54 }
 0x1ea   : > { %v2346_v47 = vadd.f32 %v2345_v45, %v2344_v42  ;;  %v1314_v42 = vmul.f32 %v1311_v1, %v1302_v22 }
 0x1eb   : > { %v1126_v44 = vadd.f32 %v2318_v39, %v2167_v14  ;;  %v1172_v46 = vadd.f32 %v2343_v41, %v1123_v38  ;;  %v1312_v14 = vmul.f32 %v1311_v1, %v1294_v6  ;;  %v1306_v41 = vpop.permute.xlu1 %1305 }
 0x1ec   : > { %v1315_v48 = vmul.f32 %v1311_v1, %v1306_v41 }
 0x1ed   : > { %v1175_v49 = vadd.f32 %v2346_v47, %v1126_v44 }
 0x1fd   : > { %v2363_v60 = vpop.f32.mrb[8].mxu0 }
 0x1fe   : > { %v2364_v61 = vpop.f32.mrb[9].mxu0 }
 0x1ff   : > { %v2365_v4 = vadd.f32 %v2364_v61, %v2363_v60  ;;  %v2366_v5 = vpop.f32.mrb[10].mxu0  ;;  %v1565_v60 = vld [vmem:[%s3677_s7 + $0x8] sm:$0xff] }
 0x200   : > { %v2367_v7 = vpop.f32.mrb[11].mxu0  ;;  %v2623_v61 = vld [vmem:[#allocation12 + $0x10] ss:$8 sps:$4 sm:$0xff]   ;;  %1609 = vperm.xlu0 %2543, %v1565_v60  }
 0x201   : > { %v1213_v10 = vadd.f32 %v2365_v4, %v1164_v27  ;;  %v2368_v11 = vadd.f32 %v2367_v7, %v2366_v5 }
 0x203   : > { %v1260_v15 = vadd.f32 %v1256_v8, %v1213_v10  ;;  %v1216_v16 = vadd.f32 %v2368_v11, %v1167_v29 }
 0x204   : > { %2545 = vset.pattern.permute.xlu0 %v3021_v3 }
 0x205   : > { %v1288_v18 = vadd.f32 %v1284_v9, %v1260_v15  ;;  %v1261_v19 = vadd.f32 %v1257_v13, %v1216_v16  ;;  %v2369_v20 = vpop.f32.mrb[12].mxu0 }
 0x206   : > { %v2370_v23 = vpop.f32.mrb[13].mxu0 }
 0x207   : > { %v1289_v24 = vadd.f32 %v1285_v17, %v1261_v19  ;;  %v2371_v25 = vadd.f32 %v2370_v23, %v2369_v20  ;;  %v2372_v26 = vpop.f32.mrb[14].mxu0  ;;  %v1316_v28 = vadd.f32 %v1312_v14, %v1288_v18 }
 0x208   : > { %v2373_v31 = vpop.f32.mrb[15].mxu0 }
 0x209   : > { %v1317_v27 = vadd.f32 %v1313_v21, %v1289_v24  ;;  %v1221_v33 = vadd.f32 %v2371_v25, %v1172_v46  ;;  %v2374_v34 = vadd.f32 %v2373_v31, %v2372_v26  ;;  %v1320_v39 = vmax.f32 %v1316_v28, 0.0  ;;  %v1462_v21 = vpop.permute.xlu0 %1461 }
 0x20b   : > { %v1321_v37 = vmax.f32 %v1317_v27, 0.0  ;;  %v1262_v29 = vadd.f32 %v1258_v32, %v1221_v33  ;;  %v1224_v38 = vadd.f32 %v2374_v34, %v1175_v49  ;;  %v2620_v49 = vld [vmem:[#allocation12] ss:$8 sps:$4 sm:$0xff]  }
 0x20d   : > { %v1290_v44 = vadd.f32 %v1286_v36, %v1262_v29  ;;  %v1263_v45 = vadd.f32 %v1259_v35, %v1224_v38  ;;  %v1324_v47 = vpack.c.bf16 %v1321_v37, %v1320_v39  ;;  %v1570_v28 = vpop.permute.xlu0 %1569  ;;  %v1584_v35 = vsub.s32 4, %v3457_v53 }
 0x20e   : > { %v1618_v37 = vsub.s32 5, %v3457_v53  ;;  %v1652_v39 = vsub.s32 6, %v3457_v53 }
 0x20f   : > { %v1318_v50 = vadd.f32 %v1314_v42, %v1290_v44  ;;  %v1291_v51 = vadd.f32 %v1287_v40, %v1263_v45  ;;  %2401 = vmatprep.mubr.bf16.mxu1 %v1324_v47  ;;  %v1550_v40 = vld [vmem:[%s3679_s29] sm:$0x3] }
 0x211   : > { %v1319_v30 = vadd.f32 %v1315_v48, %v1291_v51  ;;  %v1322_v52 = vmax.f32 %v1318_v50, 0.0  ;;  %v1555_v48 = vrot.slane %v1550_v40, %v3460_v55 }
 0x213   : > { %v1323_v46 = vmax.f32 %v1319_v30, 0.0  ;;  %v1559_v30 = vrot.slane %v1550_v40, %v3463_v56 }
 0x215   : > { %v1325_v58 = vpack.c.bf16 %v1323_v46, %v1322_v52 }
 0x217   : > { %2402 = vmatmul.mubr.bf16.vlgmr.msra.gmra.mrb[8].mxu1 %v1325_v58 }
 0x218   : > { %1541 = vmatprep.mubr.bf16.mxu1 %v3019_v2  ;;  %1510 = vmatpush1.bf16.msra.mxu1 %v2620_v49 }
 0x219   : > { %1511 = vmatprep.subr.bf16.mxu1 %v2625_v59 }
 0x21c   : > { %1512 = vmatpush1.bf16.msra.mxu1 %v2623_v61 }
 0x27f   : > { %v1610_v31 = vpop.permute.xlu0 %1609 }
 0x2ea   : > { %v2403_v2 = vpop.f32.mrb[8].mxu1 }
 0x2eb   : > { %v1431_v0 = vpop.f32.mrb[9].mxu1  ;;  %v1440_v7 = vadd.f32 %v2403_v2, %v2228_v62 }
 0x2ec   : > { %v2404_v1 = vpop.f32.mrb[10].mxu1  ;;  %v1432_v5 = vadd.f32 %v2228_v62, %v1431_v0 }
 0x2ed   : > { %v1434_v4 = vpop.f32.mrb[11].mxu1  ;;  %v1443_v9 = vadd.f32 %v2404_v1, %v2228_v62 }
 0x2ee   : > { %v1435_v6 = vadd.f32 %v2228_v62, %v1434_v4 }
 0x2f0   : > { %v1446_v8 = vadd.f32 %v1435_v6, %v1432_v5 }
 0x2f2   : > { %v1447_v10 = vadd.f32 %v1446_v8, %v1440_v7 }
 0x2f4   : > { %v1448_v11 = vadd.f32 %v1447_v10, %v1443_v9 }
 0x2f6   : > { %v1450_v12 = vand.u32 2147483647, %v1448_v11  ;;  %v1449_v18 = vmax.f32 %v1448_v11, 0.0 }
 0x2f8   : > { %v1451_v13 = vsub.f32 0.0, %v1450_v12 }
 0x2fa   : > { %v1452_v14 = vmul.f32 1.442695, %v1451_v13 }
 0x2fc   : > { %2626 = vpow2.f32 %v1452_v14 }
 0x306   : > { %v2627_v15 = vpop.eup %2626 }
 0x307   : > { %v1454_v16 = vadd.f32 1.0, %v2627_v15 }
 0x309   : > { %2628 = vlog2.f32 %v1454_v16 }
 0x313   : > { %v2629_v17 = vpop.eup %2628 }
 0x314   : > { %v1456_v19 = vmul.f32 0.6931472, %v2629_v17 }
 0x316   : > { %v1457_v20 = vadd.f32 %v1456_v19, %v1449_v18 }
 0x318   : > { %v1458_v22 = vadd.f32 0.0001, %v1457_v20 }
 0x31a   : > { %v1464_v23 = vmul.f32 %v1462_v21, %v1458_v22  ;;  %v1475_v32 = vsel %vm1474_vm0, %v1448_v11, %v1458_v22 }
 0x31c   : > { %1466 = vrot.lane.b32.xlu1 %v1464_v23, %s3023_s14 }
 0x320   : > { %1574 = vperm.xlu1 %2541, %v1565_v60  }
 0x324   : > { %2542 = vset.pattern.permute.xlu1 %v3020_v63 }
 0x325   : > { %1605 = vperm.xlu1 %2542, %v1564_v43  }
 0x329   : > { %2544 = vset.pattern.permute.xlu1 %v3021_v3  ;;  %v1566_v3 = vld [vmem:[%s3678_s0] sm:$0x77] }
 0x32a   : > { %1639 = vperm.xlu1 %2544, %v1564_v43   ;;  %v1581_v29 = vrot.slane %v1566_v3, %v3460_v55  ;;  %v1585_v38 = vrot.slane %v1566_v3, %v1584_v35  ;;  %v1615_v41 = vrot.slane %v1566_v3, %v3463_v56  ;;  %v1619_v42 = vrot.slane %v1566_v3, %v1618_v37 }
 0x32b   : > { %v1649_v47 = vrot.slane %v1566_v3, %v3466_v57  ;;  %v1653_v51 = vrot.slane %v1566_v3, %v1652_v39 }
 0x32c   : > { %v1591_v45 = vrot.slane %v1581_v29, %v3460_v55  ;;  %v1595_v50 = vrot.slane %v1585_v38, %v3460_v55  ;;  %v1625_v53 = vrot.slane %v1615_v41, %v3463_v56  ;;  %v1629_v58 = vrot.slane %v1619_v42, %v3463_v56 }
 0x32d   : > { %v1659_v59 = vrot.slane %v1649_v47, %v3466_v57  ;;  %v1663_v55 = vrot.slane %v1653_v51, %v3466_v57 }
 0x32e   : > { %1643 = vperm.xlu1 %2544, %v1565_v60   ;;  %v1596_v52 = vmul.f32 %v1591_v45, %v1570_v28  ;;  %v1597_v46 = vmul.f32 %v1595_v50, %v1570_v28  ;;  %v1632_v49 = vmul.f32 %v1625_v53, %v1610_v31  ;;  %v1633_v2 = vmul.f32 %v1629_v58, %v1610_v31 }
 0x38e   : > { %v1467_v24 = vpop.permute.xlu1 %1466 }
 0x38f   : > { %v1469_v25 = vadd.f32 %v1467_v24, %v1448_v11 }
 0x391   : > { %v1481_v26 = vpack.c.bf16 %v1469_v25, %v1469_v25  ;;  %1471 = vrot.lane.b32.xlu0 %v1469_v25, %s3024_s16 }
 0x393   : > { %2241 = vmatmul.mubr.msk.bf16.vlgmr.msra.gmra.mrb[12].mxu1 %vm1474_vm0, %v1481_v26 }
 0x39f   : > { %v1575_v34 = vpop.permute.xlu1 %1574 }
 0x3a0   : > { %v1598_v54 = vmul.f32 %v1591_v45, %v1575_v34  ;;  %v1599_v62 = vmul.f32 %v1595_v50, %v1575_v34 }
 0x3a4   : > { %v1606_v36 = vpop.permute.xlu1 %1605 }
 0x3a5   : > { %v1630_v5 = vmul.f32 %v1625_v53, %v1606_v36  ;;  %v1631_v9 = vmul.f32 %v1629_v58, %v1606_v36 }
 0x3a9   : > { %v1640_v44 = vpop.permute.xlu1 %1639 }
 0x3aa   : > { %v1664_v11 = vmul.f32 %v1659_v59, %v1640_v44  ;;  %v1665_v15 = vmul.f32 %v1663_v55, %v1640_v44 }
 0x3ad   : > { %v1644_v1 = vpop.permute.xlu1 %1643 }
 0x3ae   : > { %v1666_v14 = vmul.f32 %v1659_v59, %v1644_v1  ;;  %v1667_v18 = vmul.f32 %v1663_v55, %v1644_v1 }
 0x403   : > { %v1472_v27 = vpop.permute.xlu0 %1471 }
 0x404   : > { %v1477_v33 = vsel %vm1476_vm1, %v1475_v32, %v1472_v27 }
 0x405   : > { %v1479_v63 = vsel %vm1478_vm2, %v1477_v33, 0.0 }
 0x406   : > { %1480 = vst [vmem:[#allocation15] sm:$0xff] %v1479_v63 }
 0x466   : > { %v1543_v43 = vpop.f32.mrb[12].mxu1 }
 0x467   : > { %v1562_v60 = vadd.f32 %v1555_v48, %v1543_v43  ;;  %v1545_v61 = vpop.f32.mrb[13].mxu1 }
 0x468   : > { %v1563_v0 = vadd.f32 %v1559_v30, %v1545_v61  ;;  %v1547_v4 = vpop.f32.mrb[14].mxu1 }
 0x469   : > { %v1600_v6 = vadd.f32 %v1596_v52, %v1562_v60  ;;  %v1602_v7 = vadd.f32 %v1598_v54, %v1562_v60  ;;  %v1548_v8 = vpop.f32.mrb[15].mxu1 }
 0x46a   : > { %v1601_v56 = vadd.f32 %v1597_v46, %v1563_v0  ;;  %v1603_v10 = vadd.f32 %v1599_v62, %v1563_v0 }
 0x46b   : > { %v1634_v12 = vadd.f32 %v1630_v5, %v1600_v6  ;;  %v1636_v13 = vadd.f32 %v1632_v49, %v1602_v7 }
 0x46c   : > { %v1635_v16 = vadd.f32 %v1631_v9, %v1601_v56  ;;  %v1637_v17 = vadd.f32 %v1633_v2, %v1603_v10 }
 0x46d   : > { %v1668_v19 = vadd.f32 %v1664_v11, %v1634_v12  ;;  %v1670_v57 = vadd.f32 %v1666_v14, %v1636_v13 }
 0x46e   : > { %v1669_v20 = vadd.f32 %v1665_v15, %v1635_v16  ;;  %v1671_v21 = vadd.f32 %v1667_v18, %v1637_v17 }
 0x46f   : > { %v1672_v22 = vmax.f32 %v1668_v19, 0.0  ;;  %v1674_v23 = vmax.f32 %v1670_v57, 0.0 }
 0x470   : > { %v1673_v24 = vmax.f32 %v1669_v20, 0.0  ;;  %v1675_v25 = vmax.f32 %v1671_v21, 0.0 }
 0x471   : > { %v1676_v26 = vpack.c.bf16 %v1674_v23, %v1672_v22 }
 0x472   : > { %v1677_v28 = vpack.c.bf16 %v1675_v25, %v1673_v24 }
 0x473   : > { %1678 = vst [vmem:[#allocation2] sm:$0xff] %v1676_v26 }
 0x474   : > { %1679 = vst [vmem:[#allocation2 + $0x8] sm:$0xff] %v1677_v28 }
 0x475 PF: > { %v2630_v31 = vld [vmem:[%s3392_s17 + $0x4] ss:$8 sps:$4 sm:$0xff]   ;;  %v2632_v32 = vld [vmem:[%s3392_s17] ss:$8 sps:$4 sm:$0xff]   ;;  %v2633_v27 = vld [vmem:[%s3392_s17 + $0x14] ss:$8 sps:$4 sm:$0xff]  }
 0x476   : > { %1886 = vmatprep.subr.bf16.mxu0 %v2630_v31  ;;  %v2635_v33 = vld [vmem:[%s3392_s17 + $0x10] ss:$8 sps:$4 sm:$0xff]   ;;  %v2636_v63 = vld [vmem:[%s3392_s17 + $0x24] ss:$8 sps:$4 sm:$0xff]   ;;  %v2638_v34 = vld [vmem:[%s3392_s17 + $0x20] ss:$8 sps:$4 sm:$0xff]  }
 0x477   : > { %1887 = vmatpush1.bf16.msra.mxu0 %v2632_v32  ;;  %v2639_v3 = vld [vmem:[%s3392_s17 + $0x34] ss:$8 sps:$4 sm:$0xff]   ;;  %v2641_v35 = vld [vmem:[%s3392_s17 + $0x30] ss:$8 sps:$4 sm:$0xff]   ;;  %v2642_v36 = vld [vmem:[%s3392_s17 + $0x44] ss:$8 sps:$4 sm:$0xff]  }
 0x478   : > { %1888 = vmatprep.subr.bf16.mxu0 %v2633_v27  ;;  %v2644_v37 = vld [vmem:[%s3392_s17 + $0x40] ss:$8 sps:$4 sm:$0xff]   ;;  %v2645_v29 = vld [vmem:[%s3392_s17 + $0x54] ss:$8 sps:$4 sm:$0xff]   ;;  %v2647_v38 = vld [vmem:[%s3392_s17 + $0x50] ss:$8 sps:$4 sm:$0xff]  }
 0x479   : > { %v2648_v39 = vld [vmem:[%s3392_s17 + $0x64] ss:$8 sps:$4 sm:$0xff]   ;;  %v2650_v41 = vld [vmem:[%s3392_s17 + $0x60] ss:$8 sps:$4 sm:$0xff]   ;;  %v2651_v42 = vld [vmem:[%s3392_s17 + $0x74] ss:$8 sps:$4 sm:$0xff]  }
 0x47a   : > { %v2653_v44 = vld [vmem:[%s3392_s17 + $0x70] ss:$8 sps:$4 sm:$0xff]   ;;  %v2654_v45 = vld [vmem:[%s3392_s17 + $0x84] ss:$8 sps:$4 sm:$0xff]   ;;  %v2656_v47 = vld [vmem:[%s3392_s17 + $0x80] ss:$8 sps:$4 sm:$0xff]  }
 0x47b   : > { %1889 = vmatpush1.bf16.msra.mxu0 %v2635_v33  ;;  %v1681_v40 = vld [vmem:[#allocation2 + $0x8] sm:$0xff]  ;;  %v2660_v51 = vld [vmem:[%s3392_s17 + $0xa4] ss:$8 sps:$4 sm:$0xff]   ;;  %v2662_v30 = vld [vmem:[%s3392_s17 + $0xa0] ss:$8 sps:$4 sm:$0xff]   ;;  %s3025_s14 = smov [#allocation15]  }
 0x47c   : > { %1890 = vmatprep.subr.bf16.mxu0 %v2636_v63  ;;  %1918 = vmatprep.mubr.bf16.mxu0 %v1681_v40  ;;  %v2657_v48 = vld [vmem:[%s3392_s17 + $0x94] ss:$8 sps:$4 sm:$0xff]   ;;  %v2659_v50 = vld [vmem:[%s3392_s17 + $0x90] ss:$8 sps:$4 sm:$0xff]   ;;  %v2666_v46 = vld [vmem:[%s3392_s17 + $0xc4] ss:$8 sps:$4 sm:$0xff]  }
 0x47d   : > { %v2663_v53 = vld [vmem:[%s3392_s17 + $0xb4] ss:$8 sps:$4 sm:$0xff]   ;;  %v2665_v52 = vld [vmem:[%s3392_s17 + $0xb0] ss:$8 sps:$4 sm:$0xff]   ;;  %v2668_v58 = vld [vmem:[%s3392_s17 + $0xc0] ss:$8 sps:$4 sm:$0xff]  }
 0x47e   : > { %v2669_v43 = vld [vmem:[%s3392_s17 + $0xd4] ss:$8 sps:$4 sm:$0xff]   ;;  %v2671_v49 = vld [vmem:[%s3392_s17 + $0xd0] ss:$8 sps:$4 sm:$0xff]   ;;  %v2672_v54 = vld [vmem:[%s3392_s17 + $0xe4] ss:$8 sps:$4 sm:$0xff]  }
 0x47f   : > { %1891 = vmatpush1.bf16.msra.mxu0 %v2638_v34  ;;  %v2674_v59 = vld [vmem:[%s3392_s17 + $0xe0] ss:$8 sps:$4 sm:$0xff]   ;;  %v2675_v60 = vld [vmem:[%s3392_s17 + $0xf4] ss:$8 sps:$4 sm:$0xff]   ;;  %v2677_v61 = vld [vmem:[%s3392_s17 + $0xf0] ss:$8 sps:$4 sm:$0xff]  }
 0x480   : > { %1892 = vmatprep.subr.bf16.mxu0 %v2639_v3  ;;  %v1680_v2 = vld [vmem:[#allocation2] sm:$0xff]  ;;  %s1979_s16 = sshll.u32 %s3025_s14, 4  ;;  %p3680_p12 = scmp.eq.s32.totalorder %s3131_s24, 2  ;;  %s1980_s16 = int_to_ptr.vmem [resolvable:$true] %s1979_s16 }
 0x481   : > { %s2892_s9 = scalar_lea.vmem %s1980_s16, 128  ;;  %p2899_p8 = scmp.lt.s32.totalorder %s1980_s16, %s1980_s16 }
 0x482   : > { %p2893_p13 = scmp.ne.s32.totalorder %s1980_s16, %s2892_s9  ;;  %p2900_p4 = scmp.lt.s32.totalorder %s2892_s9, %s2892_s9 }
 0x483   : > { %1893 = vmatpush1.bf16.msra.mxu0 %v2641_v35 }
 0x484   : > { %1894 = vmatprep.subr.bf16.mxu0 %v2642_v36  ;;  %p2894_p6 = pnand %p2893_p13, %p3680_p12  ;;  %p2901_p7 = por %p2900_p4, %p2899_p8 }
 0x486   : > { %p2895_p0 = pneg %p2894_p6 }
 0x487   : > { %1895 = vmatpush1.bf16.msra.mxu0 %v2644_v37 }
 0x488   : > { %1896 = vmatprep.subr.bf16.mxu0 %v2645_v29  ;;  %p2902_p9 = pnand %p2901_p7, %p2895_p0 }
 0x48b   : > { %1897 = vmatpush1.bf16.msra.mxu0 %v2647_v38 }
 0x48c   : > { %1898 = vmatprep.subr.bf16.mxu0 %v2648_v39 }
 0x48f   : > { %1899 = vmatpush1.bf16.msra.mxu0 %v2650_v41 }
 0x490   : > { %1900 = vmatprep.subr.bf16.mxu0 %v2651_v42 }
 0x493   : > { %1901 = vmatpush1.bf16.msra.mxu0 %v2653_v44 }
 0x494   : > { %1902 = vmatprep.subr.bf16.mxu0 %v2654_v45 }
 0x497   : > { %1903 = vmatpush1.bf16.msra.mxu0 %v2656_v47 }
 0x498   : > { %1904 = vmatprep.subr.bf16.mxu0 %v2657_v48 }
 0x49b   : > { %1905 = vmatpush1.bf16.msra.mxu0 %v2659_v50 }
 0x49c   : > { %1906 = vmatprep.subr.bf16.mxu0 %v2660_v51 }
 0x49f   : > { %1907 = vmatpush1.bf16.msra.mxu0 %v2662_v30 }
 0x4a0   : > { %1908 = vmatprep.subr.bf16.mxu0 %v2663_v53 }
 0x4a3   : > { %1909 = vmatpush1.bf16.msra.mxu0 %v2665_v52 }
 0x4a4   : > { %1910 = vmatprep.subr.bf16.mxu0 %v2666_v46 }
 0x4a7   : > { %1911 = vmatpush1.bf16.msra.mxu0 %v2668_v58 }
 0x4a8   : > { %1912 = vmatprep.subr.bf16.mxu0 %v2669_v43 }
 0x4ab   : > { %1913 = vmatpush1.bf16.msra.mxu0 %v2671_v49 }
 0x4ac   : > { %1914 = vmatprep.subr.bf16.mxu0 %v2672_v54 }
 0x4af   : > { %1915 = vmatpush1.bf16.msra.mxu0 %v2674_v59 }
 0x4b0   : > { %1916 = vmatprep.subr.bf16.mxu0 %v2675_v60 }
 0x4b3   : > { %1917 = vmatpush1.bf16.msra.mxu0 %v2677_v61 }
 0x4b6   : > { %1919 = vmatmul.mubr.bf16.vlgmr.msra.gmra.mrb[0].mxu0 %v1680_v2 }
 0x4b7   : > { %2905 = shalt.err (!%p2902_p9)
}
 0x4b8   : > { %s3681_s17 = sld [smem:[#allocation33_spill]]  ;;  %p3682_p3 = pmov %p3680_p12 }
 0x4be   : > { %s2906_s26 = scalar_lea.hbm %s3681_s17, 128 }
 0x4bf   : > { %p2907_p2 = scmp.ne.s32.totalorder %s3681_s17, %s2906_s26  ;;  %p2912_p1 = scmp.lt.u32.totalorder %s2906_s26, %s3681_s17 }
 0x4c1   : > { %p2908_p5 = pnand %p2907_p2, %p3682_p3 }
 0x4c3   : > { %p2909_p10 = pneg %p2908_p5 }
 0x4c5   : > { %p2914_p11 = pnand %p2912_p1, %p2909_p10 }
 0x4c7   : > { %2917 = shalt.err (!%p2914_p11)
}
 0x4c8   : > { %p3683_p13 = pmov %p3682_p3  ;;  %v1716_v62 = vlaneseq  ;;  %s3684_s23 = scalar_lea.vmem %s3626_s13, %s3696_s30 }
 0x4c9   : > { %v1714_v1 = vld [vmem:[%s3684_s23] sm:$0x3]  ;;  %s2290_s1 = sshll.u32 %s3131_s24, 7  ;;  %s1992_s4 = sshll.u32 %s3406_s3, 4  ;;  %s3564_s4 = int_to_ptr.vmem [resolvable:$true] %s1992_s4 }
 0x4ca   : > { %2432 = dma.vmem_to_hbm [thread:$0]  (%p3683_p13), %s1980_s16, 128, %s3681_s17, [#allocation5]   ;;  %v1717_v55 = vshrl.u32 %v1716_v62, 7 }
 0x4cb   : > { %s3685_s26 = sld [smem:[#allocation34_spill]]  ;;  %s2918_s9 = scalar_lea.vmem %s3564_s4, 256 }
 0x4cc   : > { %v1718_v0 = vsub.s32 0, %v1717_v55  ;;  %v1722_v4 = vsub.s32 1, %v1717_v55  ;;  %p2919_p12 = scmp.ne.s32.totalorder %s3564_s4, %s2918_s9  ;;  %p3686_p6 = scmp.ne.s32.totalorder %s3658_s27, 0 }
 0x4cd   : > { %s3026_s11 = smov [#allocation16]  }
 0x4ce   : > { %v1719_v5 = vrot.slane %v1714_v1, %v1718_v0  ;;  %v1723_v6 = vrot.slane %v1714_v1, %v1722_v4  ;;  %p2920_p0 = pnand %p2919_p12, %p3686_p6  ;;  %s2922_s0 = sshll.u32 %s3026_s11, 4  ;;  %s2923_s0 = int_to_ptr.vmem [resolvable:$false] %s2922_s0 }
 0x4cf   : > { %s2924_s23 = scalar_lea.vmem %s2923_s0, 512  ;;  %p2925_p4 = scmp.lt.s32.totalorder %s3564_s4, %s2923_s0 }
 0x4d0   : > { %p2921_p8 = pneg %p2920_p0  ;;  %p2926_p7 = scmp.lt.s32.totalorder %s2924_s23, %s2918_s9 }
 0x4d1   : > { %s3562_s29 = scalar_lea.hbm %s3685_s26, %s2290_s1 }
 0x4d2   : > { %p2927_p9 = por %p2926_p7, %p2925_p4 }
 0x4d4   : > { %p2928_p2 = pnand %p2927_p9, %p2921_p8 }
 0x589   : > { %v1920_v7 = vpop.f32.mrb[0].mxu0 }
 0x58a   : > { %v1921_v8 = vadd.f32 %v1920_v7, %v1719_v5  ;;  %v1922_v9 = vpop.f32.mrb[1].mxu0 }
 0x58b   : > { %v1923_v56 = vadd.f32 %v1922_v9, %v1723_v6  ;;  %v1924_v10 = vpop.f32.mrb[2].mxu0 }
 0x58c   : > { %v2274_v11 = vmul.f32 -1.442695, %v1921_v8  ;;  %v1925_v12 = vadd.f32 %v1924_v10, %v1719_v5  ;;  %v1926_v13 = vpop.f32.mrb[3].mxu0 }
 0x58d   : > { %v2275_v14 = vmul.f32 -1.442695, %v1923_v56  ;;  %v1927_v15 = vadd.f32 %v1926_v13, %v1723_v6 }
 0x58e   : > { %2678 = vpow2.f32 %v2274_v11  ;;  %v2276_v16 = vmul.f32 -1.442695, %v1925_v12 }
 0x58f   : > { %2680 = vpow2.f32 %v2275_v14  ;;  %v2277_v17 = vmul.f32 -1.442695, %v1927_v15 }
 0x590   : > { %2682 = vpow2.f32 %v2276_v16 }
 0x591   : > { %2684 = vpow2.f32 %v2277_v17 }
 0x598   : > { %v2679_v18 = vpop.eup %2678 }
 0x599   : > { %v2681_v19 = vpop.eup %2680  ;;  %v1941_v57 = vadd.f32 1.0, %v2679_v18 }
 0x59a   : > { %v2683_v20 = vpop.eup %2682  ;;  %v1942_v21 = vadd.f32 1.0, %v2681_v19 }
 0x59b   : > { %v2685_v22 = vpop.eup %2684  ;;  %2686 = vrcp.f32 %v1941_v57  ;;  %v1943_v23 = vadd.f32 1.0, %v2683_v20 }
 0x59c   : > { %2688 = vrcp.f32 %v1942_v21  ;;  %v1944_v24 = vadd.f32 1.0, %v2685_v22 }
 0x59d   : > { %2690 = vrcp.f32 %v1943_v23 }
 0x59e   : > { %2692 = vrcp.f32 %v1944_v24 }
 0x5a5   : > { %v2687_v25 = vpop.eup %2686 }
 0x5a6   : > { %v2689_v26 = vpop.eup %2688 }
 0x5a7   : > { %v2691_v28 = vpop.eup %2690  ;;  %v2288_v31 = vpack.c.bf16 %v2689_v26, %v2687_v25 }
 0x5a8   : > { %v2693_v32 = vpop.eup %2692 }
 0x5a9   : > { %1965 = vst [vmem:[%s3406_s3] sm:$0xff] %v2288_v31  ;;  %v2289_v27 = vpack.c.bf16 %v2693_v32, %v2691_v28 }
 0x5ab   : > { %1966 = vst [vmem:[%s3406_s3 + $0x8] sm:$0xff] %v2289_v27 }
 0x5ac   : > { %2931 = shalt.err (!%p2928_p2)
}
 0x5ad   : > { %s2932_s3 = scalar_lea.hbm %s3562_s29, 256  ;;  %s2936_s16 = scalar_lea.hbm %s3685_s26, 768 }
 0x5ae   : > { %p2933_p3 = scmp.ne.s32.totalorder %s3562_s29, %s2932_s3  ;;  %p2937_p1 = scmp.lt.u32.totalorder %s3562_s29, %s3685_s26 }
 0x5af   : > { %p2938_p11 = scmp.lt.u32.totalorder %s2936_s16, %s2932_s3  ;;  %p2940_p12 = scmp.lt.u32.totalorder %s2932_s3, %s3562_s29 }
 0x5b0   : > { %p2934_p5 = pnand %p2933_p3, %p3686_p6 }
 0x5b1   : > { %p2939_p13 = por %p2938_p11, %p2937_p1 }
 0x5b2   : > { %p2935_p10 = pneg %p2934_p5 }
 0x5b3   : > { %p2941_p0 = por %p2940_p12, %p2939_p13 }
 0x5b5   : > { %p2942_p8 = pnand %p2941_p0, %p2935_p10 }
 0x5b7   : > { %2945 = shalt.err (!%p2942_p8)
}
 0x5b8   : > { %s3027_s9 = smov 128   ;;  %s3028_s23 = smov 384  }
 0x5b9   : > { %s3029_s14 = smov 8   ;;  %s3687_s1 = scalar_lea.sflag [#allocation17], %s3389_s15 }
 0x5ba   : > { %2433 = dma.vmem_to_hbm [thread:$0]  (%p3686_p6), %s3564_s4, 256, %s3562_s29, %s3687_s1, %s3027_s9, %s3028_s23, %s3029_s14  }
 0x5bb   : > { %p3688_p4 = scmp.eq.s32.totalorder %s3131_s24, 2 }
 0x5bd   : > { %2983 = dma.done.wait (%p3688_p4), [#allocation5], 128   ;;  %p3689_p7 = pmov %p3688_p4 }
 0x5bf   : > { %2985 = vsyncadd (%p3689_p7), [#allocation5], 4294967168 }
 0x5c0 PF: > { %p2479_p9 = scmp.ge.s32.totalorder %s3004_s21, 2  ;;  %s2011_s3 = sand.u32 1, %s2992_s18  }
 0x5c1   : > { %p3690_p2 = scmp.ne.s32.totalorder %s3659_s2, 0  ;;  %s2012_s30 = scalar_lea.sflag [#allocation17], %s2011_s3 }
 0x5c3   : > { %p2461_p3 = pnand %p2479_p9, %p3690_p2 }
 0x5c5   : > { %2987 = dma.done.wait (!%p2461_p3), %s2012_s30, 256  }
 0x5c6   : > { %2989 = vsyncadd (!%p2461_p3), %s2012_s30, 4294967040  ;;  %p31_p6 = scmp.ge.s32.totalorder %s3287_s22, 5   ;;  %s3691_s18 = smov %s2996_s19 }
 0x5c7   : > { %s3692_s19 = smov %s3000_s20  ;;  %s3693_s20 = smov %s3298_s28 }
 0x5c8   : > { %s3694_s21 = smov %s3287_s22  ;;  %33 = sbr.rel (!%p31_p6) target bundleno = 19 (0x13), region = 160 }
 0x5cf   :  { %2017 = vsyncpa [#allocation4], 1 }
 0x5d0   :  { %2019 = vsyncpa [#allocation4 + $0x1], 1 }
 0x5d1   :  { %2020 = vsyncpa [#allocation7], 1 }
 0x5d2   :  { %2021 = vsyncpa [#allocation10], 1 }
 0x5d3   :  { %2022 = vsyncpa [#allocation13], 1 }
 0x5d4   :  { %2023 = vsyncpa [#allocation5], 1 }
 0x5d5   :  { %2025 = vsyncpa [#allocation5 + $0x1], 1 }
 0x5d6   :  { %2026 = vsyncpa [#allocation17], 1 }
 0x5d7   :  { %2028 = vsyncpa [#allocation17 + $0x1], 1 }

</bundles_post_ra>
